<compile_context>
chip_gen: v5e
topology: v5e:2x2
jax: 0.10.0
libtpu: 0.0.40
codegen_flags: <defaults>
</compile_context>

<pallas_src>
import functools
import math

import jax
import jax.numpy as jnp
from jax.experimental import pallas as pl
from jax.experimental.pallas import tpu as pltpu

MATMUL_DTYPE = jnp.bfloat16      # MXU operand dtype; accumulation stays float32


def _round_up(x, m):
    return (x + m - 1) // m * m


def _cdiv(a, b):
    return (a + b - 1) // b


# ----------------------------- Pallas kernel -----------------------------

def dres_block_kernel(x_ref, halo_ref, step_ref, wdp_ref, bdp_ref,
                      wcat_ref, bdil_ref, wout_ref, bout_ref,
                      xnext_ref, skip_ref, ycat_scr,
                      *, C, L, TL, d, conditioner):
    """One (batch, length-tile) grid step of DResidualBlock.forward."""
    t = pl.program_id(1)
    inv_sqrt2 = 1.0 / math.sqrt(2.0)

    x_c = x_ref[0]                                        # (C, TL)  f32 : this tile of x
    halo = halo_ref[0, 0]                                 # (C, HW)  f32 : [:, :d]=left ctx, [:, d:2d]=right ctx
    HW = halo.shape[-1]

    if conditioner:
        # diffusion_projection(diffusion_step) = Linear(512, C), broadcast along length.
        dproj = (jnp.sum(wdp_ref[...] * step_ref[0], axis=1, keepdims=True)
                 + bdp_ref[...])                          # (C, 1) f32 (VPU/XLU; no M=1 MXU pass)
        # Add it only on real positions [0, L) so the conv's zero padding stays exact.
        col = jax.lax.broadcasted_iota(jnp.int32, (1, TL), 1)
        y_c = x_c + jnp.where(t * TL + col < L, dproj, 0.0)
        hcol = jax.lax.broadcasted_iota(jnp.int32, (1, HW), 1)
        gpos_h = jnp.where(hcol < d, t * TL - d + hcol, t * TL + TL + (hcol - d))
        hvalid = jnp.logical_and(gpos_h >= 0, gpos_h < L)
        y_h = halo + jnp.where(hvalid, dproj, 0.0)
    else:
        y_c = x_c
        y_h = halo

    # Pack the three dilated-conv taps (y[g-d], y[g], y[g+d]) into (3C, TL) so the whole
    # k=3 dilated conv is a single K=3C MXU matmul.  Shifts via pltpu.roll; the d wrapped
    # boundary columns are overwritten with the neighbour-tile halo values.
    ycat_scr[C:2 * C, :] = y_c.astype(MATMUL_DTYPE)
    ycat_scr[0:C, :] = pltpu.roll(y_c, shift=d, axis=1).astype(MATMUL_DTYPE)
    ycat_scr[0:C, 0:d] = y_h[:, 0:d].astype(MATMUL_DTYPE)
    ycat_scr[2 * C:3 * C, :] = pltpu.roll(y_c, shift=TL - d, axis=1).astype(MATMUL_DTYPE)
    ycat_scr[2 * C:3 * C, TL - d:TL] = y_h[:, d:2 * d].astype(MATMUL_DTYPE)

    z = (jnp.dot(wcat_ref[...], ycat_scr[...], preferred_element_type=jnp.float32)
         + bdil_ref[...])                                 # (2C, TL) f32
    gate = z[:C, :]
    filt = z[C:, :]
    h = (jax.nn.sigmoid(gate) * jnp.tanh(filt)).astype(MATMUL_DTYPE)

    o = (jnp.dot(wout_ref[...], h, preferred_element_type=jnp.float32)
         + bout_ref[...])                                 # (2C, TL) f32
    xnext_ref[0] = ((x_c + o[:C, :]) * inv_sqrt2).astype(xnext_ref.dtype)
    skip_ref[0] = o[C:, :].astype(skip_ref.dtype)


# ----------------------------- wrapper -----------------------------

@functools.partial(jax.jit, static_argnames=("dilation", "conditioner", "tile_len"))
def dres_block_forward(x, diffusion_step, params, *, dilation, conditioner=True,
                       tile_len=2048):
    """Pallas TPU forward of DResidualBlock.

    x:              (B, C, L)  float32   (residual_channels activations)
    diffusion_step: (B, 512)   float32   (output of DiffWave's diffusion-embedding MLP)
    Returns ((x + residual) / sqrt(2), skip), both (B, C, L) float32.
    """
    B, C, L = x.shape
    d = int(dilation)
    assert d >= 1 and L >= 1
    assert C % 8 == 0, "residual_channels must be a multiple of 8 for TPU sublane tiling"

    TL = min(_round_up(int(tile_len), 128), _round_up(L, 128))   # lane-dense tile length
    assert d <= TL, "dilation must not exceed the length tile; raise tile_len"
    n_tiles = _cdiv(L, TL)
    Lp = n_tiles * TL
    HW = _round_up(2 * d, 128)

    # Zero-pad length to whole tiles (the padding is exactly the conv's zero padding).
    x_p = jnp.pad(x, ((0, 0), (0, 0), (0, Lp - L))) if Lp > L else x

    # Tiny per-tile halo side array: the d columns of x just left / right of each tile
    # (zero outside [0, L)).  Avoids materialising overlapping halo-extended windows.
    starts = jnp.arange(n_tiles) * TL
    hpos = jnp.concatenate(
        [starts[:, None] - d + jnp.arange(d)[None, :],              # left context
         starts[:, None] + TL + jnp.arange(d)[None, :]], axis=1)    # right context  (n_tiles, 2d)
    hvalid = jnp.logical_and(hpos >= 0, hpos < L)
    halo = jnp.take(x, jnp.clip(hpos, 0, L - 1), axis=2)            # (B, C, n_tiles, 2d)
    halo = jnp.where(hvalid[None, None], halo, 0.0)
    halo = jnp.transpose(halo, (0, 2, 1, 3))                        # (B, n_tiles, C, 2d)
    halo = jnp.pad(halo, ((0, 0), (0, 0), (0, 0), (0, HW - 2 * d)))

    # Weight packing (checkpoint mapping): wcat = [W[:,:,0] | W[:,:,1] | W[:,:,2]] pairs with
    # tap rows [y[g-d]; y[g]; y[g+d]] of the Conv1d(C, 2C, 3, padding=d, dilation=d).
    w_dil = params['w_dil']                                         # (2C, C, 3)
    wcat = jnp.concatenate([w_dil[:, :, 0], w_dil[:, :, 1], w_dil[:, :, 2]],
                           axis=1).astype(MATMUL_DTYPE)             # (2C, 3C)
    bdil = params['b_dil'].reshape(2 * C, 1)
    wout = params['w_out'].astype(MATMUL_DTYPE)                     # (2C, C)  output_projection
    bout = params['b_out'].reshape(2 * C, 1)
    wdp = params['w_dp']                                            # (C, 512) diffusion_projection
    bdp = params['b_dp'].reshape(C, 1)
    step3 = diffusion_step.reshape(B, 1, 512)

    kernel = functools.partial(dres_block_kernel, C=C, L=L, TL=TL, d=d,
                               conditioner=bool(conditioner))
    tile_map = lambda b, t: (b, 0, t)
    halo_map = lambda b, t: (b, t, 0, 0)
    batch_map = lambda b, t: (b, 0, 0)
    const2 = lambda b, t: (0, 0)

    x_next, skip = pl.pallas_call(
        kernel,
        out_shape=(jax.ShapeDtypeStruct((B, C, Lp), jnp.float32),
                   jax.ShapeDtypeStruct((B, C, Lp), jnp.float32)),
        grid=(B, n_tiles),
        in_specs=[
            pl.BlockSpec((1, C, TL), tile_map),          # x tile
            pl.BlockSpec((1, 1, C, HW), halo_map),       # neighbour halo columns
            pl.BlockSpec((1, 1, 512), batch_map),        # diffusion embedding (this batch row)
            pl.BlockSpec((C, 512), const2),              # diffusion_projection weight
            pl.BlockSpec((C, 1), const2),                # diffusion_projection bias
            pl.BlockSpec((2 * C, 3 * C), const2),        # dilated_conv taps, concatenated (bf16)
            pl.BlockSpec((2 * C, 1), const2),            # dilated_conv bias
            pl.BlockSpec((2 * C, C), const2),            # output_projection weight (bf16)
            pl.BlockSpec((2 * C, 1), const2),            # output_projection bias
        ],
        out_specs=(pl.BlockSpec((1, C, TL), tile_map),
                   pl.BlockSpec((1, C, TL), tile_map)),
        scratch_shapes=[pltpu.VMEM((3 * C, TL), MATMUL_DTYPE)],
        compiler_params=pltpu.CompilerParams(
            dimension_semantics=("parallel", "parallel")),
    )(x_p, halo, step3, wdp, bdp, wcat, bdil, wout, bout)

    return x_next[:, :, :L], skip[:, :, :L]


# ----------------------------- pure-JAX reference -----------------------------

def dres_block_reference(x, diffusion_step, params, *, dilation, conditioner=True):
    """Reference DResidualBlock.forward (mirrors the kernel's bf16 operand rounding)."""
    B, C, L = x.shape
    d = dilation
    hp = jax.lax.Precision.HIGHEST
    q = lambda a: a.astype(MATMUL_DTYPE).astype(jnp.float32)

    dp = (jnp.einsum('bk,ck->bc', diffusion_step, params['w_dp'], precision=hp)
          + params['b_dp'][None, :])
    y = (x + dp[:, :, None]) if conditioner else x
    ypad = jnp.pad(y, ((0, 0), (0, 0), (d, d)))
    z = params['b_dil'][None, :, None] + sum(
        jnp.einsum('oc,bcl->bol', q(params['w_dil'][:, :, k]),
                   q(ypad[:, :, k * d:k * d + L]), precision=hp)
        for k in range(3))
    h = jax.nn.sigmoid(z[:, :C]) * jnp.tanh(z[:, C:])
    o = (jnp.einsum('oc,bcl->bol', q(params['w_out']), q(h), precision=hp)
         + params['b_out'][None, :, None])
    return (x + o[:, :C]) / math.sqrt(2.0), o[:, C:]


# ----------------------------- demo / self-check -----------------------------

if __name__ == "__main__":
    key = jax.random.PRNGKey(0)
    k1, k2, k3, k4, k5, k6, k7, k8 = jax.random.split(key, 8)

    B, C, L = 2, 64, 200            # batch, residual_channels, audio length (small demo)

    params = {
        # dilated_conv: Conv1d(C, 2C, 3) with kaiming-normal init
        'w_dil': math.sqrt(2.0 / (3 * C)) * jax.random.normal(k1, (2 * C, C, 3), jnp.float32),
        'b_dil': 0.05 * jax.random.normal(k2, (2 * C,), jnp.float32),
        # diffusion_projection: Linear(512, C)
        'w_dp': (1.0 / math.sqrt(512.0)) * jax.random.normal(k3, (C, 512), jnp.float32),
        'b_dp': 0.05 * jax.random.normal(k4, (C,), jnp.float32),
        # output_projection: Conv1d(C, 2C, 1)
        'w_out': math.sqrt(2.0 / C) * jax.random.normal(k5, (2 * C, C), jnp.float32),
        'b_out': 0.05 * jax.random.normal(k6, (2 * C,), jnp.float32),
    }
    x = jax.random.normal(k7, (B, C, L), jnp.float32)
    diffusion_step = jax.random.normal(k8, (B, 512), jnp.float32)

    # (dilation, tile_len, conditioner): multi-tile + halo path, no-conditioner branch,
    # and a single-tile / larger-dilation configuration.
    configs = [(2, 128, True), (2, 128, False), (4, 2048, True)]
    for dil, tl, cond in configs:
        out_x, out_skip = dres_block_forward(x, diffusion_step, params,
                                             dilation=dil, conditioner=cond, tile_len=tl)
        out_x, out_skip = jax.block_until_ready((out_x, out_skip))
        assert out_x.shape == (B, C, L) and out_skip.shape == (B, C, L)
        assert out_x.dtype == jnp.float32 and out_skip.dtype == jnp.float32
        assert bool(jnp.isfinite(out_x).all()) and bool(jnp.isfinite(out_skip).all())

        ref_x, ref_skip = dres_block_reference(x, diffusion_step, params,
                                               dilation=dil, conditioner=cond)
        err = max(float(jnp.max(jnp.abs(out_x - ref_x))),
                  float(jnp.max(jnp.abs(out_skip - ref_skip))))
        assert err < 5e-3, f"max |pallas - reference| = {err} (dil={dil}, tile={tl}, cond={cond})"

    print("KERNEL_OK")
</pallas_src>

<mosaic_0001>
module attributes {stable_mosaic.version = 11 : i64} {
  func.func @dres_block_kernel(%arg0: i32, %arg1: i32, %arg2: memref<1x64x128xf32, #tpu.memory_space<vmem>>, %arg3: memref<1x1x64x128xf32, #tpu.memory_space<vmem>>, %arg4: memref<1x1x512xf32, #tpu.memory_space<vmem>>, %arg5: memref<64x512xf32, #tpu.memory_space<vmem>>, %arg6: memref<64x1xf32, #tpu.memory_space<vmem>>, %arg7: memref<128x192xbf16, #tpu.memory_space<vmem>>, %arg8: memref<128x1xf32, #tpu.memory_space<vmem>>, %arg9: memref<128x64xbf16, #tpu.memory_space<vmem>>, %arg10: memref<128x1xf32, #tpu.memory_space<vmem>>, %arg11: memref<1x64x128xf32, #tpu.memory_space<vmem>>, %arg12: memref<1x64x128xf32, #tpu.memory_space<vmem>>, %arg13: memref<192x128xbf16, #tpu.memory_space<vmem>>) attributes {dimension_semantics = [#tpu.dimension_semantics<parallel>, #tpu.dimension_semantics<parallel>], iteration_bounds = array<i64: 2, 2>, scalar_prefetch = 0 : i64, scratch_operands = 1 : i64, tpu.core_type = #tpu.core_type<tc>, window_params = [{transform_indices = @transform_0, window_bounds = array<i64: 1, 64, 128>}, {transform_indices = @transform_1, window_bounds = array<i64: 1, 1, 64, 128>}, {transform_indices = @transform_2, window_bounds = array<i64: 1, 1, 512>}, {pipeline_mode = #tpu.pipeline_mode<synchronous>, transform_indices = @transform_3, window_bounds = array<i64: 64, 512>}, {pipeline_mode = #tpu.pipeline_mode<synchronous>, transform_indices = @transform_4, window_bounds = array<i64: 64, 1>}, {pipeline_mode = #tpu.pipeline_mode<synchronous>, transform_indices = @transform_5, window_bounds = array<i64: 128, 192>}, {pipeline_mode = #tpu.pipeline_mode<synchronous>, transform_indices = @transform_6, window_bounds = array<i64: 128, 1>}, {pipeline_mode = #tpu.pipeline_mode<synchronous>, transform_indices = @transform_7, window_bounds = array<i64: 128, 64>}, {pipeline_mode = #tpu.pipeline_mode<synchronous>, transform_indices = @transform_8, window_bounds = array<i64: 128, 1>}, {transform_indices = @transform_9, window_bounds = array<i64: 1, 64, 128>}, {transform_indices = @transform_10, window_bounds = array<i64: 1, 64, 128>}]} {
    %c0 = arith.constant 0 : index
    %c0_0 = arith.constant 0 : index
    %c0_1 = arith.constant 0 : index
    %0 = vector.load %arg2[%c0, %c0_0, %c0_1] : memref<1x64x128xf32, #tpu.memory_space<vmem>>, vector<1x64x128xf32>
    %1 = vector.shape_cast %0 : vector<1x64x128xf32> to vector<64x128xf32>
    %c0_2 = arith.constant 0 : index
    %c0_3 = arith.constant 0 : index
    %c0_4 = arith.constant 0 : index
    %c0_5 = arith.constant 0 : index
    %2 = vector.load %arg3[%c0_2, %c0_3, %c0_4, %c0_5] : memref<1x1x64x128xf32, #tpu.memory_space<vmem>>, vector<1x1x64x128xf32>
    %3 = vector.shape_cast %2 : vector<1x1x64x128xf32> to vector<64x128xf32>
    %c0_6 = arith.constant 0 : index
    %c0_7 = arith.constant 0 : index
    %4 = vector.load %arg5[%c0_6, %c0_7] : memref<64x512xf32, #tpu.memory_space<vmem>>, vector<64x512xf32>
    %c0_8 = arith.constant 0 : index
    %c0_9 = arith.constant 0 : index
    %c0_10 = arith.constant 0 : index
    %5 = vector.load %arg4[%c0_8, %c0_9, %c0_10] : memref<1x1x512xf32, #tpu.memory_space<vmem>>, vector<1x1x512xf32>
    %6 = vector.shape_cast %5 : vector<1x1x512xf32> to vector<1x512xf32>
    %7 = vector.broadcast %6 : vector<1x512xf32> to vector<64x512xf32>
    %8 = arith.mulf %4, %7 : vector<64x512xf32>
    %cst = arith.constant dense<0.000000e+00> : vector<64xf32>
    %9 = vector.multi_reduction <add>, %8, %cst [1] : vector<64x512xf32> to vector<64xf32>
    %10 = vector.shape_cast %9 : vector<64xf32> to vector<64x1xf32>
    %c0_11 = arith.constant 0 : index
    %c0_12 = arith.constant 0 : index
    %11 = vector.load %arg6[%c0_11, %c0_12] : memref<64x1xf32, #tpu.memory_space<vmem>>, vector<64x1xf32>
    %12 = arith.addf %10, %11 : vector<64x1xf32>
    %13 = tpu.iota {dimensions = array<i32: 1>} : vector<1x128xi32>
    %c128_i32 = arith.constant 128 : i32
    %14 = arith.muli %arg1, %c128_i32 : i32
    %15 = vector.broadcast %14 : i32 to vector<1x128xi32>
    %16 = arith.addi %15, %13 : vector<1x128xi32>
    %c200_i32 = arith.constant 200 : i32
    %17 = vector.broadcast %c200_i32 : i32 to vector<1x128xi32>
    %18 = arith.cmpi slt, %16, %17 : vector<1x128xi32>
    %cst_13 = arith.constant 0.000000e+00 : f32
    %19 = vector.shape_cast %18 : vector<1x128xi1> to vector<1x128xi1>
    %20 = vector.broadcast %19 : vector<1x128xi1> to vector<64x128xi1>
    %21 = vector.shape_cast %12 : vector<64x1xf32> to vector<64x1xf32>
    %22 = vector.broadcast %21 : vector<64x1xf32> to vector<64x128xf32>
    %23 = vector.broadcast %cst_13 : f32 to vector<64x128xf32>
    %24 = arith.select %20, %22, %23 : vector<64x128xi1>, vector<64x128xf32>
    %25 = arith.addf %1, %24 : vector<64x128xf32>
    %26 = tpu.iota {dimensions = array<i32: 1>} : vector<1x128xi32>
    %c2_i32 = arith.constant 2 : i32
    %27 = vector.broadcast %c2_i32 : i32 to vector<1x128xi32>
    %28 = arith.cmpi slt, %26, %27 : vector<1x128xi32>
    %c128_i32_14 = arith.constant 128 : i32
    %29 = arith.muli %arg1, %c128_i32_14 : i32
    %c2_i32_15 = arith.constant 2 : i32
    %30 = arith.subi %29, %c2_i32_15 : i32
    %31 = vector.broadcast %30 : i32 to vector<1x128xi32>
    %32 = arith.addi %31, %26 : vector<1x128xi32>
    %c128_i32_16 = arith.constant 128 : i32
    %33 = arith.muli %arg1, %c128_i32_16 : i32
    %c128_i32_17 = arith.constant 128 : i32
    %34 = arith.addi %33, %c128_i32_17 : i32
    %c2_i32_18 = arith.constant 2 : i32
    %35 = vector.broadcast %c2_i32_18 : i32 to vector<1x128xi32>
    %36 = arith.subi %26, %35 : vector<1x128xi32>
    %37 = vector.broadcast %34 : i32 to vector<1x128xi32>
    %38 = arith.addi %37, %36 : vector<1x128xi32>
    %39 = arith.select %28, %32, %38 : vector<1x128xi1>, vector<1x128xi32>
    %c0_i32 = arith.constant 0 : i32
    %40 = vector.broadcast %c0_i32 : i32 to vector<1x128xi32>
    %41 = arith.cmpi sge, %39, %40 : vector<1x128xi32>
    %c200_i32_19 = arith.constant 200 : i32
    %42 = vector.broadcast %c200_i32_19 : i32 to vector<1x128xi32>
    %43 = arith.cmpi slt, %39, %42 : vector<1x128xi32>
    %44 = arith.andi %41, %43 : vector<1x128xi1>
    %cst_20 = arith.constant 0.000000e+00 : f32
    %45 = vector.shape_cast %44 : vector<1x128xi1> to vector<1x128xi1>
    %46 = vector.broadcast %45 : vector<1x128xi1> to vector<64x128xi1>
    %47 = vector.shape_cast %12 : vector<64x1xf32> to vector<64x1xf32>
    %48 = vector.broadcast %47 : vector<64x1xf32> to vector<64x128xf32>
    %49 = vector.broadcast %cst_20 : f32 to vector<64x128xf32>
    %50 = arith.select %46, %48, %49 : vector<64x128xi1>, vector<64x128xf32>
    %51 = arith.addf %3, %50 : vector<64x128xf32>
    %52 = arith.truncf %25 : vector<64x128xf32> to vector<64x128xbf16>
    %c64 = arith.constant 64 : index
    %c0_21 = arith.constant 0 : index
    %53 = vector.load %arg13[%c64, %c0_21] : memref<192x128xbf16, #tpu.memory_space<vmem>>, vector<64x128xbf16>
    tpu.vector_store %arg13[%c64, %c0_21], %52 {strides = array<i32>} : memref<192x128xbf16, #tpu.memory_space<vmem>>, vector<64x128xbf16>,
    %c2_i32_22 = arith.constant 2 : i32
    %54 = tpu.dynamic_rotate %25 by %c2_i32_22 dim 1 : vector<64x128xf32>, i32 -> vector<64x128xf32>
    %55 = arith.truncf %54 : vector<64x128xf32> to vector<64x128xbf16>
    %c0_23 = arith.constant 0 : index
    %c0_24 = arith.constant 0 : index
    %56 = vector.load %arg13[%c0_23, %c0_24] : memref<192x128xbf16, #tpu.memory_space<vmem>>, vector<64x128xbf16>
    tpu.vector_store %arg13[%c0_23, %c0_24], %55 {strides = array<i32>} : memref<192x128xbf16, #tpu.memory_space<vmem>>, vector<64x128xbf16>,
    %57 = vector.extract_strided_slice %51 {offsets = [0, 0], sizes = [64, 2], strides = [1, 1]} : vector<64x128xf32> to vector<64x2xf32>
    %58 = arith.truncf %57 : vector<64x2xf32> to vector<64x2xbf16>
    %c0_25 = arith.constant 0 : index
    %c0_26 = arith.constant 0 : index
    %59 = vector.load %arg13[%c0_25, %c0_26] : memref<192x128xbf16, #tpu.memory_space<vmem>>, vector<64x2xbf16>
    tpu.vector_store %arg13[%c0_25, %c0_26], %58 {strides = array<i32>} : memref<192x128xbf16, #tpu.memory_space<vmem>>, vector<64x2xbf16>,
    %c126_i32 = arith.constant 126 : i32
    %60 = tpu.dynamic_rotate %25 by %c126_i32 dim 1 : vector<64x128xf32>, i32 -> vector<64x128xf32>
    %61 = arith.truncf %60 : vector<64x128xf32> to vector<64x128xbf16>
    %c128 = arith.constant 128 : index
    %c0_27 = arith.constant 0 : index
    %62 = vector.load %arg13[%c128, %c0_27] : memref<192x128xbf16, #tpu.memory_space<vmem>>, vector<64x128xbf16>
    tpu.vector_store %arg13[%c128, %c0_27], %61 {strides = array<i32>} : memref<192x128xbf16, #tpu.memory_space<vmem>>, vector<64x128xbf16>,
    %63 = vector.extract_strided_slice %51 {offsets = [0, 2], sizes = [64, 2], strides = [1, 1]} : vector<64x128xf32> to vector<64x2xf32>
    %64 = arith.truncf %63 : vector<64x2xf32> to vector<64x2xbf16>
    %c128_28 = arith.constant 128 : index
    %c126 = arith.constant 126 : index
    %65 = vector.load %arg13[%c128_28, %c126] : memref<192x128xbf16, #tpu.memory_space<vmem>>, vector<64x2xbf16>
    tpu.vector_store %arg13[%c128_28, %c126], %64 {strides = array<i32>} : memref<192x128xbf16, #tpu.memory_space<vmem>>, vector<64x2xbf16>,
    %c0_29 = arith.constant 0 : index
    %c0_30 = arith.constant 0 : index
    %66 = vector.load %arg7[%c0_29, %c0_30] : memref<128x192xbf16, #tpu.memory_space<vmem>>, vector<128x192xbf16>
    %c0_31 = arith.constant 0 : index
    %c0_32 = arith.constant 0 : index
    %67 = vector.load %arg13[%c0_31, %c0_32] : memref<192x128xbf16, #tpu.memory_space<vmem>>, vector<192x128xbf16>
    %cst_33 = arith.constant dense<0.000000e+00> : vector<128x128xf32>
    %68 = tpu.matmul %66, %67, %cst_33 {dimension_numbers = #tpu.dot_dimension_numbers<[1], [0], [0], [1], [0, 0, 1, 1], [], []>} : vector<128x192xbf16>, vector<192x128xbf16>, vector<128x128xf32> -> vector<128x128xf32>
    %c0_34 = arith.constant 0 : index
    %c0_35 = arith.constant 0 : index
    %69 = vector.load %arg8[%c0_34, %c0_35] : memref<128x1xf32, #tpu.memory_space<vmem>>, vector<128x1xf32>
    %70 = vector.broadcast %69 : vector<128x1xf32> to vector<128x128xf32>
    %71 = arith.addf %68, %70 : vector<128x128xf32>
    %72 = vector.extract_strided_slice %71 {offsets = [0, 0], sizes = [64, 128], strides = [1, 1]} : vector<128x128xf32> to vector<64x128xf32>
    %73 = vector.extract_strided_slice %71 {offsets = [64, 0], sizes = [64, 128], strides = [1, 1]} : vector<128x128xf32> to vector<64x128xf32>
    %74 = arith.negf %72 : vector<64x128xf32>
    %75 = math.exp %74 : vector<64x128xf32>
    %cst_36 = arith.constant 1.000000e+00 : f32
    %76 = vector.broadcast %cst_36 : f32 to vector<64x128xf32>
    %77 = arith.addf %76, %75 : vector<64x128xf32>
    %78 = arith.divf %76, %77 : vector<64x128xf32>
    %79 = math.tanh %73 : vector<64x128xf32>
    %80 = arith.mulf %78, %79 : vector<64x128xf32>
    %81 = arith.truncf %80 : vector<64x128xf32> to vector<64x128xbf16>
    %c0_37 = arith.constant 0 : index
    %c0_38 = arith.constant 0 : index
    %82 = vector.load %arg9[%c0_37, %c0_38] : memref<128x64xbf16, #tpu.memory_space<vmem>>, vector<128x64xbf16>
    %cst_39 = arith.constant dense<0.000000e+00> : vector<128x128xf32>
    %83 = tpu.matmul %82, %81, %cst_39 {dimension_numbers = #tpu.dot_dimension_numbers<[1], [0], [0], [1], [0, 0, 1, 1], [], []>} : vector<128x64xbf16>, vector<64x128xbf16>, vector<128x128xf32> -> vector<128x128xf32>
    %c0_40 = arith.constant 0 : index
    %c0_41 = arith.constant 0 : index
    %84 = vector.load %arg10[%c0_40, %c0_41] : memref<128x1xf32, #tpu.memory_space<vmem>>, vector<128x1xf32>
    %85 = vector.broadcast %84 : vector<128x1xf32> to vector<128x128xf32>
    %86 = arith.addf %83, %85 : vector<128x128xf32>
    %87 = vector.extract_strided_slice %86 {offsets = [0, 0], sizes = [64, 128], strides = [1, 1]} : vector<128x128xf32> to vector<64x128xf32>
    %88 = arith.addf %1, %87 : vector<64x128xf32>
    %cst_42 = arith.constant 0.707106769 : f32
    %89 = vector.broadcast %cst_42 : f32 to vector<64x128xf32>
    %90 = arith.mulf %88, %89 : vector<64x128xf32>
    %c0_43 = arith.constant 0 : index
    %c0_44 = arith.constant 0 : index
    %c0_45 = arith.constant 0 : index
    %91 = vector.load %arg11[%c0_43, %c0_44, %c0_45] : memref<1x64x128xf32, #tpu.memory_space<vmem>>, vector<1x64x128xf32>
    %92 = vector.shape_cast %91 : vector<1x64x128xf32> to vector<64x128xf32>
    %93 = vector.shape_cast %90 : vector<64x128xf32> to vector<1x64x128xf32>
    tpu.vector_store %arg11[%c0_43, %c0_44, %c0_45], %93 {strides = array<i32>} : memref<1x64x128xf32, #tpu.memory_space<vmem>>, vector<1x64x128xf32>,
    %94 = vector.extract_strided_slice %86 {offsets = [64, 0], sizes = [64, 128], strides = [1, 1]} : vector<128x128xf32> to vector<64x128xf32>
    %c0_46 = arith.constant 0 : index
    %c0_47 = arith.constant 0 : index
    %c0_48 = arith.constant 0 : index
    %95 = vector.load %arg12[%c0_46, %c0_47, %c0_48] : memref<1x64x128xf32, #tpu.memory_space<vmem>>, vector<1x64x128xf32>
    %96 = vector.shape_cast %95 : vector<1x64x128xf32> to vector<64x128xf32>
    %97 = vector.shape_cast %94 : vector<64x128xf32> to vector<1x64x128xf32>
    tpu.vector_store %arg12[%c0_46, %c0_47, %c0_48], %97 {strides = array<i32>} : memref<1x64x128xf32, #tpu.memory_space<vmem>>, vector<1x64x128xf32>,
    return
  }
  func.func @transform_0(%arg0: i32, %arg1: i32) -> (i32, i32, i32) {
    %c0_i32 = arith.constant 0 : i32
    %c0_i32_0 = arith.constant 0 : i32
    return %arg0, %c0_i32, %arg1 : i32, i32, i32
  }
  func.func @transform_1(%arg0: i32, %arg1: i32) -> (i32, i32, i32, i32) {
    %c0_i32 = arith.constant 0 : i32
    %c0_i32_0 = arith.constant 0 : i32
    %c0_i32_1 = arith.constant 0 : i32
    return %arg0, %arg1, %c0_i32, %c0_i32_0 : i32, i32, i32, i32
  }
  func.func @transform_2(%arg0: i32, %arg1: i32) -> (i32, i32, i32) {
    %c0_i32 = arith.constant 0 : i32
    %c0_i32_0 = arith.constant 0 : i32
    %c0_i32_1 = arith.constant 0 : i32
    return %arg0, %c0_i32, %c0_i32_0 : i32, i32, i32
  }
  func.func @transform_3(%arg0: i32, %arg1: i32) -> (i32, i32) {
    %c0_i32 = arith.constant 0 : i32
    %c0_i32_0 = arith.constant 0 : i32
    %c0_i32_1 = arith.constant 0 : i32
    return %c0_i32, %c0_i32_0 : i32, i32
  }
  func.func @transform_4(%arg0: i32, %arg1: i32) -> (i32, i32) {
    %c0_i32 = arith.constant 0 : i32
    %c0_i32_0 = arith.constant 0 : i32
    %c0_i32_1 = arith.constant 0 : i32
    return %c0_i32, %c0_i32_0 : i32, i32
  }
  func.func @transform_5(%arg0: i32, %arg1: i32) -> (i32, i32) {
    %c0_i32 = arith.constant 0 : i32
    %c0_i32_0 = arith.constant 0 : i32
    %c0_i32_1 = arith.constant 0 : i32
    return %c0_i32, %c0_i32_0 : i32, i32
  }
  func.func @transform_6(%arg0: i32, %arg1: i32) -> (i32, i32) {
    %c0_i32 = arith.constant 0 : i32
    %c0_i32_0 = arith.constant 0 : i32
    %c0_i32_1 = arith.constant 0 : i32
    return %c0_i32, %c0_i32_0 : i32, i32
  }
  func.func @transform_7(%arg0: i32, %arg1: i32) -> (i32, i32) {
    %c0_i32 = arith.constant 0 : i32
    %c0_i32_0 = arith.constant 0 : i32
    %c0_i32_1 = arith.constant 0 : i32
    return %c0_i32, %c0_i32_0 : i32, i32
  }
  func.func @transform_8(%arg0: i32, %arg1: i32) -> (i32, i32) {
    %c0_i32 = arith.constant 0 : i32
    %c0_i32_0 = arith.constant 0 : i32
    %c0_i32_1 = arith.constant 0 : i32
    return %c0_i32, %c0_i32_0 : i32, i32
  }
  func.func @transform_9(%arg0: i32, %arg1: i32) -> (i32, i32, i32) {
    %c0_i32 = arith.constant 0 : i32
    %c0_i32_0 = arith.constant 0 : i32
    return %arg0, %c0_i32, %arg1 : i32, i32, i32
  }
  func.func @transform_10(%arg0: i32, %arg1: i32) -> (i32, i32, i32) {
    %c0_i32 = arith.constant 0 : i32
    %c0_i32_0 = arith.constant 0 : i32
    return %arg0, %c0_i32, %arg1 : i32, i32, i32
  }
}

</mosaic_0001>

<bundles_post_ra>
// kernel: dres_block_forward.1
= control target key start
LH: loop header
LB: loop body
LE: loop exit
PB: predicated region body
PF: predicated region fallthrough
CT: control target
= control target key end

     0   :  { %s3545_s0 = inlined_call_operand.vmem [shape: f32[2,64,256], index: 0, kind: input, shape index: {}]   ;;  %s3546_s1 = inlined_call_operand.vmem [shape: f32[2,2,64,128], index: 1, kind: input, shape index: {}]   ;;  %s3547_s2 = inlined_call_operand.vmem [shape: f32[2,1,512], index: 2, kind: input, shape index: {}]   ;;  %s3548_s3 = inlined_call_operand.vmem [shape: f32[64,512], index: 3, kind: input, shape index: {}]   ;;  %s3549_s4 = inlined_call_operand.vmem [shape: f32[64,1], index: 4, kind: input, shape index: {}]   ;;  %s3550_s5 = inlined_call_operand.vmem [shape: bf16[128,192], index: 5, kind: input, shape index: {}]   ;;  %s3551_s6 = inlined_call_operand.vmem [shape: f32[128,1], index: 6, kind: input, shape index: {}]   ;;  %s3552_s7 = inlined_call_operand.vmem [shape: bf16[128,64], index: 7, kind: input, shape index: {}]   ;;  %s3553_s8 = inlined_call_operand.vmem [shape: f32[128,1], index: 8, kind: input, shape index: {}]   ;;  %s3554_s9 = inlined_call_operand.hbm [shape: f32[2,64,256], index: 9, kind: output, shape index: {0}]   ;;  %s3555_s10 = inlined_call_operand.hbm [shape: f32[2,64,256], index: 10, kind: output, shape index: {1}]  }
   0x1   :  { %3563 = sst [smem:[#allocation16_spill]] %s3545_s0 }
   0x2   :  { %16 = vsyncpa [#allocation5], 0 }
   0x3   :  { %18 = vsyncpa [#allocation5 + $0x1], 0 }
   0x4   :  { %19 = vsyncpa [#allocation7], 0 }
   0x5   :  { %21 = vsyncpa [#allocation7 + $0x1], 0  ;;  %s2594_s13 = smov 0   ;;  %s2596_s14 = smov 0  }
   0x6   :  { %s2598_s15 = smov 0   ;;  %s2600_s16 = smov 0  }
   0x7   :  { %s2602_s17 = smov 0   ;;  %s2604_s18 = smov 0  }
   0x8   :  { %s2606_s19 = smov 0   ;;  %s2608_s20 = smov 0  }
   0x9 LB: > { %3564 = sst [smem:[#allocation10_spill]] %s2502_s13  ;;  %s1905_s21 = sadd.s32 4294967295, %s2530_s20   ;;  %s2530_s20 = sphi %s2608_s20, %s27_s20   ;;  %s2526_s19 = sphi %s2606_s19, %s3596_s19   ;;  %s2522_s18 = sphi %s2604_s18, %s3595_s18   ;;  %s2518_s17 = sphi %s2602_s17, %s3594_s17   ;;  %s2514_s16 = sphi %s2600_s16, %s3593_s16   ;;  %s2510_s15 = sphi %s2598_s15, %s3599_s15   ;;  %s2506_s14 = sphi %s2596_s14, %s3598_s14   ;;  %s2502_s13 = sphi %s2594_s13, %s3597_s13  }
   0xa   : > { %3565 = sst [smem:[#allocation11_spill]] %s2522_s18  ;;  %s1906_s22 = sadd.s32 4294967294, %s2530_s20  }
   0xb   : > { %3566 = sst [smem:[#allocation12_spill]] %s2526_s19  ;;  %s36_s23 = sadd.s32 1, %s2522_s18 }
   0xc   : > { %p37_p0 = scmp.ge.s32.totalorder %s36_s23, 2  ;;  %s39_s24 = sadd.s32 1, %s2526_s19 }
   0xd   : > { %p55_p1 = scmp.ne.s32.totalorder %s2510_s15, %s2506_s14  ;;  %p56_p2 = scmp.eq.s32.totalorder %s2530_s20, 0 }
   0xe   : > { %s3601_s23 = smov (%p37_p0, %s36_s23), 0  ;;  %s3603_s24 = smov (!%p37_p0, %s39_s24), %s2526_s19 }
   0xf   : > { %3567 = sst [smem:[#allocation13_spill]] %s3601_s23  ;;  %s44_s25 = ssub.s32 %s2522_s18, %s3601_s23 }
  0x10   : > { %p2646_p3 = por %p56_p2, %p55_p1  ;;  %p41_p4 = scmp.ge.s32.totalorder %s3603_s24, 2 }
  0x11   : > { %p267_p5 = scmp.eq.s32.totalorder %s1905_s21, 3  ;;  %p272_p6 = scmp.ne.s32.totalorder %s2506_s14, %s2502_s13 }
  0x12   : > { %p273_p7 = scmp.eq.s32.totalorder %s1906_s22, 3  ;;  %s3605_s24 = smov (%p41_p4, %s3603_s24), 0 }
  0x13   : > { %3569 = sst [smem:[#allocation14_spill]] %s3605_s24  ;;  %p2654_p8 = por %p267_p5, %p55_p1 }
  0x14   : > { %p2658_p9 = por %p273_p7, %p272_p6  ;;  %s43_s29 = ssub.s32 %s2526_s19, %s3605_s24 }
  0x15   : > { %s45_s30 = sor.u32 %s44_s25, %s43_s29  ;;  %s48_s11 = sadd.s32 1, %s2510_s15 }
  0x16   : > { %s3571_s28 = scalar_select %p2658_p9, 1, 0 }
  0x17   : > { %p46_p10 = scmp.eq.s32.totalorder %s45_s30, 0  ;;  %p1908_p11 = scmp.ge.s32.totalorder %s2530_s20, 4 }
  0x18   : > { %3572 = sst [smem:[#allocation15_spill]] %s3571_s28 }
  0x19   : > { %s2666_s12 = scalar_select %p46_p10, %s2510_s15, %s48_s11  }
  0x1a   : > { %335 = sbr.rel (%p1908_p11) target bundleno = 49 (0x31), region = 40 }
  0x1f   : > { %338 = sbr.rel (!%p2646_p3) target bundleno = 49 (0x31), region = 44  ;;  %s340_s21 = sand.u32 (%p2646_p3), 1, %s2510_s15  }
  0x20   : > { %s1910_s22 = sshll.u32 (%p2646_p3), %s2526_s19, 4  ;;  %s1909_s23 = sshll.u32 (%p2646_p3), %s340_s21, 6 }
  0x21   : > { %s344_s13 = sadd.s32 (%p2646_p3), %s2522_s18, %s1910_s22  ;;  %s3573_s0 = sld [smem:[#allocation16_spill]] (%p2646_p3) }
  0x22   : > { %s1911_s28 = sshll.u32 (%p2646_p3), %s344_s13, 3  ;;  %s342_s30 = scalar_lea.vmem (%p2646_p3), [#allocation3], %s1909_s23 }
  0x27   : > { %s346_s29 = scalar_lea.vmem %s3573_s0, %s1911_s28 }
  0x28   : > { %v389_v0 = vld [vmem:[%s346_s29] sm:$0xff]  ;;  %v391_v1 = vld [vmem:[%s346_s29 + $0x10] sm:$0xff] }
  0x29   : > { %v393_v2 = vld [vmem:[%s346_s29 + $0x20] sm:$0xff]  ;;  %390 = vst [vmem:[%s342_s30] sm:$0xff] %v389_v0  ;;  %v395_v3 = vld [vmem:[%s346_s29 + $0x30] sm:$0xff] }
  0x2a   : > { %392 = vst [vmem:[%s342_s30 + $0x8] sm:$0xff] %v391_v1  ;;  %v397_v4 = vld [vmem:[%s346_s29 + $0x40] sm:$0xff]  ;;  %v399_v5 = vld [vmem:[%s346_s29 + $0x50] sm:$0xff] }
  0x2b   : > { %394 = vst [vmem:[%s342_s30 + $0x10] sm:$0xff] %v393_v2  ;;  %v401_v6 = vld [vmem:[%s346_s29 + $0x60] sm:$0xff]  ;;  %v403_v7 = vld [vmem:[%s346_s29 + $0x70] sm:$0xff] }
  0x2c   : > { %396 = vst [vmem:[%s342_s30 + $0x18] sm:$0xff] %v395_v3 }
  0x2d   : > { %398 = vst [vmem:[%s342_s30 + $0x20] sm:$0xff] %v397_v4 }
  0x2e   : > { %400 = vst [vmem:[%s342_s30 + $0x28] sm:$0xff] %v399_v5 }
  0x2f   : > { %402 = vst [vmem:[%s342_s30 + $0x30] sm:$0xff] %v401_v6 }
  0x30   : > { %404 = vst [vmem:[%s342_s30 + $0x38] sm:$0xff] %v403_v7 }
  0x31 PF: > { %p1912_p12 = scmp.ge.s32.totalorder %s2530_s20, 1  ;;  %p428_p13 = scmp.lt.s32.totalorder %s2530_s20, 5 }
  0x33   : > { %p429_p0 = pnand %p1912_p12, %p428_p13 }
  0x34   : > { %p490_p1 = scmp.lt.s32.totalorder (!%p429_p0), %s2518_s17, 1  ;;  %p492_p2 = scmp.lt.s32.totalorder (!%p429_p0), %s2514_s16, 1 }
  0x35   : > { %432 = sbr.rel (%p429_p0) target bundleno = 975 (0x3cf), region = 90  ;;  %s2868_s0 = sand.u32 (!%p429_p0), 1, %s2506_s14  }
  0x36   : > { %s2873_s19 = sshll.u32 (!%p429_p0), %s2868_s0, 6 }
  0x3a   : > { %s2681_s13 = scalar_select %p490_p1, %s2518_s17, 1  ;;  %v544_v8 = vld [vmem:[%s3548_s3 + $0xc0] sm:$0xff]  ;;  %v545_v9 = vld [vmem:[%s3548_s3 + $0xc8] sm:$0xff]  ;;  %v546_v10 = vld [vmem:[%s3548_s3 + $0xd0] sm:$0xff]  ;;  %vm800_vm5 = vcmask 11264   ;;  %vm873_vm6 = vcmask 1044464  }
  0x3b   : > { %v547_v11 = vld [vmem:[%s3548_s3 + $0xd8] sm:$0xff]  ;;  %v536_v13 = vld [vmem:[%s3548_s3 + $0x80] sm:$0xff]  ;;  %v537_v18 = vld [vmem:[%s3548_s3 + $0x88] sm:$0xff]  ;;  %s493_s22 = scalar_select %p492_p2, %s2514_s16, 1  ;;  %vm1162_vm7 = vcmask 523264  }
  0x3c   : > { %s1919_s23 = sshll.u32 %s2681_s13, 2  ;;  %v538_v19 = vld [vmem:[%s3548_s3 + $0x90] sm:$0xff]  ;;  %v528_v20 = vld [vmem:[%s3548_s3 + $0x40] sm:$0xff]  ;;  %v529_v21 = vld [vmem:[%s3548_s3 + $0x48] sm:$0xff]  ;;  %s1917_s29 = sshll.u32 %s2681_s13, 4 }
  0x3d   : > { %s502_s28 = scalar_lea.vmem %s3547_s2, %s1919_s23  ;;  %v530_v22 = vld [vmem:[%s3548_s3 + $0x50] sm:$0xff]  ;;  %v539_v26 = vld [vmem:[%s3548_s3 + $0x98] sm:$0xff]  ;;  %v548_v27 = vld [vmem:[%s3548_s3 + $0xe0] sm:$0xff]  ;;  %s1916_s25 = sshll.u32 %s493_s22, 3 }
  0x3e   : > { %v552_v12 = vld [vmem:[%s502_s28] sm:$0xf]  ;;  %v549_v28 = vld [vmem:[%s3548_s3 + $0xe8] sm:$0xff]  ;;  %v531_v33 = vld [vmem:[%s3548_s3 + $0x58] sm:$0xff]  ;;  %s1920_s28 = sshll.u32 %s2514_s16, 7  ;;  %s496_s30 = sadd.s32 %s1917_s29, %s1916_s25 }
  0x3f   : > { %v2702_v14 = vperm.slane %v552_v12, 0  ;;  %v2704_v15 = vperm.slane %v552_v12, 1  ;;  %v2706_v16 = vperm.slane %v552_v12, 2  ;;  %v2708_v17 = vperm.slane %v552_v12, 3  ;;  %v550_v34 = vld [vmem:[%s3548_s3 + $0xf0] sm:$0xff]  ;;  %v540_v39 = vld [vmem:[%s3548_s3 + $0xa0] sm:$0xff] }
  0x40   : > { %v541_v40 = vld [vmem:[%s3548_s3 + $0xa8] sm:$0xff]  ;;  %v542_v45 = vld [vmem:[%s3548_s3 + $0xb0] sm:$0xff]  ;;  %v551_v49 = vld [vmem:[%s3548_s3 + $0xf8] sm:$0xff]  ;;  %s1921_s18 = sadd.s32 4294967294, %s1920_s28  ;;  %s718_s21 = sadd.s32 128, %s1920_s28 }
  0x41   : > { %v586_v23 = vmul.f32 %v2702_v14, %v544_v8  ;;  %v587_v24 = vmul.f32 %v2704_v15, %v545_v9  ;;  %v588_v25 = vmul.f32 %v2706_v16, %v546_v10  ;;  %v589_v29 = vmul.f32 %v2708_v17, %v547_v11  ;;  %v532_v51 = vld [vmem:[%s3548_s3 + $0x60] sm:$0xff]  ;;  %v533_v56 = vld [vmem:[%s3548_s3 + $0x68] sm:$0xff]  ;;  %v534_v57 = vld [vmem:[%s3548_s3 + $0x70] sm:$0xff]  ;;  %s1918_s24 = sshll.u32 %s496_s30, 3  ;;  %s2533_s13 = smov 124  }
  0x42   : > { %v578_v30 = vmul.f32 %v2702_v14, %v536_v13  ;;  %v579_v31 = vmul.f32 %v2704_v15, %v537_v18  ;;  %v580_v32 = vmul.f32 %v2706_v16, %v538_v19  ;;  %v570_v36 = vmul.f32 %v2702_v14, %v528_v20  ;;  %v543_v60 = vld [vmem:[%s3548_s3 + $0xb8] sm:$0xff]  ;;  %v524_v62 = vld [vmem:[%s3548_s3 + $0x20] sm:$0xff]  ;;  %v525_v63 = vld [vmem:[%s3548_s3 + $0x28] sm:$0xff]  ;;  %s2854_s11 = scalar_lea.vmem %s3546_s1, %s1918_s24  ;;  %s3440_s29 = scalar_lea.vmem [#allocation6], %s2873_s19 }
  0x43   : > { %v624_v35 = vadd.f32 %v587_v24, %v586_v23  ;;  %v571_v37 = vmul.f32 %v2704_v15, %v529_v21  ;;  %v572_v38 = vmul.f32 %v2706_v16, %v530_v22  ;;  %v581_v41 = vmul.f32 %v2708_v17, %v539_v26  ;;  %v535_v3 = vld [vmem:[%s3548_s3 + $0x78] sm:$0xff]  ;;  %v520_v5 = vld [vmem:[%s3548_s3] sm:$0xff]  ;;  %v521_v10 = vld [vmem:[%s3548_s3 + $0x8] sm:$0xff]  ;;  %s3444_s30 = scalar_lea.vmem [#allocation4], %s2873_s19 }
  0x44   : > { %v614_v42 = vadd.f32 %v579_v31, %v578_v30  ;;  %v590_v43 = vmul.f32 %v2702_v14, %v548_v27  ;;  %v591_v44 = vmul.f32 %v2704_v15, %v549_v28  ;;  %v573_v47 = vmul.f32 %v2708_v17, %v531_v33  ;;  %v522_v19 = vld [vmem:[%s3548_s3 + $0x10] sm:$0xff]  ;;  %v523_v31 = vld [vmem:[%s3548_s3 + $0x18] sm:$0xff] }
  0x45   : > { %v625_v46 = vadd.f32 %v624_v35, %v588_v25  ;;  %v604_v48 = vadd.f32 %v571_v37, %v570_v36  ;;  %v592_v50 = vmul.f32 %v2706_v16, %v550_v34  ;;  %v582_v54 = vmul.f32 %v2702_v14, %v540_v39  ;;  %v526_v22 = vld [vmem:[%s3548_s3 + $0x30] sm:$0xff] }
  0x46   : > { %v615_v52 = vadd.f32 %v614_v42, %v580_v32  ;;  %v629_v53 = vadd.f32 %v591_v44, %v590_v43  ;;  %v583_v55 = vmul.f32 %v2704_v15, %v541_v40  ;;  %v584_v61 = vmul.f32 %v2706_v16, %v542_v45  ;;  %v640_v39 = vld [vmem:[%s3549_s4 + $0x30] sm:$0xff]  ;;  %v638_v40 = vld [vmem:[%s3549_s4 + $0x20] sm:$0xff]  ;;  %v641_v45 = vld [vmem:[%s3549_s4 + $0x38] sm:$0xff] }
  0x47   : > { %v626_v58 = vadd.f32 %v625_v46, %v589_v29  ;;  %v605_v59 = vadd.f32 %v604_v48, %v572_v38  ;;  %v593_v1 = vmul.f32 %v2708_v17, %v551_v49  ;;  %v574_v4 = vmul.f32 %v2702_v14, %v532_v51  ;;  %v639_v46 = vld [vmem:[%s3549_s4 + $0x28] sm:$0xff]  ;;  %v637_v48 = vld [vmem:[%s3549_s4 + $0x18] sm:$0xff] }
  0x48   : > { %v616_v0 = vadd.f32 %v615_v52, %v581_v41  ;;  %v619_v2 = vadd.f32 %v583_v55, %v582_v54  ;;  %v630_v7 = vadd.f32 %v629_v53, %v592_v50  ;;  %v575_v8 = vmul.f32 %v2704_v15, %v533_v56  ;;  %v636_v54 = vld [vmem:[%s3549_s4 + $0x10] sm:$0xff]  ;;  %v635_v55 = vld [vmem:[%s3549_s4 + $0x8] sm:$0xff] }
  0x49   : > { %627 = vadd.xlane.f32.xlu0 %v626_v58  ;;  %v606_v6 = vadd.f32 %v605_v59, %v573_v47  ;;  %v576_v9 = vmul.f32 %v2706_v16, %v534_v57  ;;  %v585_v11 = vmul.f32 %v2708_v17, %v543_v60  ;;  %v566_v13 = vmul.f32 %v2702_v14, %v524_v62  ;;  %v634_v59 = vld [vmem:[%s3549_s4] sm:$0xff] }
  0x4a   : > { %617 = vadd.xlane.f32.xlu1 %v616_v0  ;;  %v620_v12 = vadd.f32 %v619_v2, %v584_v61  ;;  %v567_v18 = vmul.f32 %v2704_v15, %v525_v63  ;;  %v577_v20 = vmul.f32 %v2708_v17, %v535_v3  ;;  %v609_v21 = vadd.f32 %v575_v8, %v574_v4 }
  0x4b   : > { %607 = vadd.xlane.f32.xlu2 %v606_v6  ;;  %v562_v23 = vmul.f32 %v2702_v14, %v520_v5  ;;  %v563_v24 = vmul.f32 %v2704_v15, %v521_v10  ;;  %v631_v25 = vadd.f32 %v630_v7, %v593_v1  ;;  %v564_v27 = vmul.f32 %v2706_v16, %v522_v19  ;;  %v527_v14 = vld [vmem:[%s3548_s3 + $0x38] sm:$0xff]  ;;  %v518_v7 = vld [vmem:[%s2854_s11 + $0x30] sm:$0xff] }
  0x4c   : > { %v610_v26 = vadd.f32 %v609_v21, %v576_v9  ;;  %v621_v28 = vadd.f32 %v620_v12, %v585_v11  ;;  %v568_v29 = vmul.f32 %v2706_v16, %v526_v22  ;;  %v599_v30 = vadd.f32 %v567_v18, %v566_v13  ;;  %v516_v22 = vld [vmem:[%s2854_s11 + $0x20] sm:$0xff]  ;;  %v928_v6 = vld [vmem:[%s3551_s6 + $0x30] sm:$0xff] }
  0x4d   : > { %v594_v32 = vadd.f32 %v563_v24, %v562_v23  ;;  %v565_v15 = vmul.f32 %v2708_v17, %v523_v31  ;;  %v569_v35 = vmul.f32 %v2708_v17, %v527_v14  ;;  %v2532_v38 = vmov 0  }
  0x4e   : > { %v611_v33 = vadd.f32 %v610_v26, %v577_v20  ;;  %v600_v36 = vadd.f32 %v599_v30, %v568_v29  ;;  %2307 = vset.pattern.permute.xlu1 %v2532_v38  ;;  %2305 = vset.pattern.permute.xlu2 %v2532_v38  ;;  %v650_v62 = vlaneseq  ;;  %v716_v1 = vstv %s1921_s18  ;;  %s2877_s18 = scalar_lea.vmem [#allocation3], %s2873_s19  ;;  %s2093_s19 = sshll.u32 %s2518_s17, 4 }
  0x4f   : > { %v595_v34 = vadd.f32 %v594_v32, %v564_v27  ;;  %2306 = vset.pattern.permute.xlu0 %v2532_v38  ;;  %v720_v2 = vstv %s718_s21  ;;  %v653_v12 = vstv %s1920_s28  ;;  %v509_v19 = vld [vmem:[%s2877_s18 + $0x28] sm:$0xff]  ;;  %v508_v21 = vld [vmem:[%s2877_s18 + $0x20] sm:$0xff]  ;;  %s2534_s28 = smov 126   ;;  %s2535_s21 = smov 2  }
  0x50   : > { %v601_v37 = vadd.f32 %v600_v36, %v569_v35  ;;  %v651_v63 = vand.u32 127, %v650_v62  ;;  %v514_v32 = vld [vmem:[%s2854_s11 + $0x10] sm:$0xff]  ;;  %v519_v35 = vld [vmem:[%s2854_s11 + $0x38] sm:$0xff]  ;;  %v505_v62 = vld [vmem:[%s2877_s18 + $0x8] sm:$0xff]  ;;  %s3460_s24 = sadd.s32 %s2514_s16, %s2093_s19 }
  0x51   : > { %632 = vadd.xlane.f32.xlu0 %v631_v25  ;;  %v596_v16 = vadd.f32 %v595_v34, %v565_v15  ;;  %v510_v14 = vld [vmem:[%s2877_s18 + $0x30] sm:$0xff]  ;;  %v511_v34 = vld [vmem:[%s2877_s18 + $0x38] sm:$0xff]  ;;  %s3562_s23 = sshll.u32 %s3460_s24, 3 }
  0x52   : > { %622 = vadd.xlane.f32.xlu1 %v621_v28  ;;  %v1922_v0 = vadd.s32 4294967294, %v651_v63  ;;  %v717_v3 = vadd.s32 %v716_v1, %v651_v63  ;;  %vm714_vm0 = vcmp.lt.s32.totalorder %v651_v63, 2  ;;  %v2870_v13 = vadd.s32 %v653_v12, %v651_v63  ;;  %s1732_s17 = scalar_lea.hbm %s3554_s9, %s3562_s23 }
  0x53   : > { %612 = vadd.xlane.f32.xlu2 %v611_v33  ;;  %s1735_s16 = sshll.u32 %s1732_s17, 4  ;;  %s1736_s16 = int_to_ptr.hbm [resolvable:$true] %s1735_s16 }
  0x54   : > { %v721_v4 = vadd.s32 %v1922_v0, %v720_v2  ;;  %vm655_vm4 = vcmp.lt.s32.totalorder %v2870_v13, 200 }
  0x56   : > { %v722_v5 = vsel %vm714_vm0, %v717_v3, %v721_v4  ;;  %v515_v4 = vld [vmem:[%s2854_s11 + $0x18] sm:$0xff] }
  0x57   : > { %vm723_vm1 = vcmp.ge.s32.totalorder %v722_v5, 0  ;;  %vm724_vm2 = vcmp.lt.s32.totalorder %v722_v5, 200 }
  0x58   : > { %vm2856_vm3 = vmand %vm723_vm1, %vm724_vm2 }
  0x59   : > { %597 = vadd.xlane.f32.xlu0 %v596_v16  ;;  %v506_v16 = vld [vmem:[%s2877_s18 + $0x10] sm:$0xff] }
  0x5a   : > { %602 = vadd.xlane.f32.xlu1 %v601_v37 }
  0xbc   : > { %v628_v41 = vpop.xlane.xlu0 %627 }
  0xbd   : > { %v648_v17 = vadd.f32 %v640_v39, %v628_v41  ;;  %v618_v42 = vpop.xlane.xlu1 %617  ;;  %v507_v39 = vld [vmem:[%s2877_s18 + $0x18] sm:$0xff] }
  0xbe   : > { %v646_v43 = vadd.f32 %v638_v40, %v618_v42  ;;  %v608_v44 = vpop.xlane.xlu2 %607 }
  0xbf   : > { %690 = vperm.xlu2 %2305, %v648_v17   ;;  %v644_v56 = vadd.f32 %v636_v54, %v608_v44 }
  0xc0   : > { %680 = vperm.xlu1 %2307, %v646_v43  }
  0xc4   : > { %v633_v47 = vpop.xlane.xlu0 %632 }
  0xc5   : > { %v649_v49 = vadd.f32 %v641_v45, %v633_v47  ;;  %v623_v50 = vpop.xlane.xlu1 %622 }
  0xc6   : > { %v647_v51 = vadd.f32 %v639_v46, %v623_v50  ;;  %v613_v52 = vpop.xlane.xlu2 %612 }
  0xc7   : > { %v645_v53 = vadd.f32 %v637_v48, %v613_v52  ;;  %695 = vperm.xlu0 %2306, %v649_v49  }
  0xc8   : > { %685 = vperm.xlu2 %2305, %v647_v51   ;;  %v517_v51 = vld [vmem:[%s2854_s11 + $0x28] sm:$0xff] }
  0xc9   : > { %675 = vperm.xlu1 %2307, %v645_v53  }
  0xcc   : > { %v598_v60 = vpop.xlane.xlu0 %597 }
  0xcd   : > { %v603_v57 = vpop.xlane.xlu1 %602  ;;  %v642_v61 = vadd.f32 %v634_v59, %v598_v60  ;;  %v504_v59 = vld [vmem:[%s2877_s18] sm:$0xff] }
  0xce   : > { %v643_v58 = vadd.f32 %v635_v55, %v603_v57 }
  0xd0   : > { %670 = vperm.xlu2 %2305, %v644_v56   ;;  %v512_v56 = vld [vmem:[%s2854_s11] sm:$0xff] }
  0xd1   : > { %665 = vperm.xlu1 %2307, %v643_v58  }
  0xd8   : > { %660 = vperm.xlu2 %2305, %v642_v61  }
 0x119   : > { %v691_v8 = vpop.permute.xlu2 %690 }
 0x11a   : > { %v734_v9 = vsel %vm2856_vm3, %v691_v8, 0.0  ;;  %v704_v15 = vsel %vm655_vm4, %v691_v8, 0.0 }
 0x11b   : > { %v742_v10 = vadd.f32 %v734_v9, %v518_v7  ;;  %v712_v17 = vadd.f32 %v704_v15, %v510_v14  ;;  %v923_v14 = vld [vmem:[%s3551_s6 + $0x8] sm:$0xff]  ;;  %v932_v15 = vld [vmem:[%s3551_s6 + $0x50] sm:$0xff] }
 0x11d   : > { %v2863_v11 = vpack.c.bf16 %v742_v10, %v742_v10 }
 0x11f   : > { %861 = vrot.lane.b32.xlu2 %v2863_v11, %s2533_s13 }
 0x122   : > { %v686_v18 = vpop.permute.xlu2 %685 }
 0x123   : > { %v703_v20 = vsel %vm655_vm4, %v686_v18, 0.0  ;;  %v733_v52 = vsel %vm2856_vm3, %v686_v18, 0.0 }
 0x124   : > { %v711_v23 = vadd.f32 %v703_v20, %v509_v19  ;;  %v741_v58 = vadd.f32 %v733_v52, %v517_v51  ;;  %v513_v19 = vld [vmem:[%s2854_s11 + $0x8] sm:$0xff]  ;;  %v1477_v51 = vld [vmem:[%s3553_s8 + $0x20] sm:$0xff]  ;;  %s1733_s11 = sshll.u32 %s3444_s30, 4  ;;  %s1734_s11 = int_to_ptr.vmem [resolvable:$true] %s1733_s11 }
 0x126   : > { %v2931_v1 = vpack.c.bf16 %v741_v58, %v741_v58 }
 0x12a   : > { %v671_v27 = vpop.permute.xlu2 %670 }
 0x12b   : > { %v730_v33 = vsel %vm2856_vm3, %v671_v27, 0.0  ;;  %v700_v37 = vsel %vm655_vm4, %v671_v27, 0.0  ;;  %v927_v27 = vld [vmem:[%s3551_s6 + $0x28] sm:$0xff] }
 0x12c   : > { %v738_v38 = vadd.f32 %v730_v33, %v514_v32  ;;  %v708_v47 = vadd.f32 %v700_v37, %v506_v16  ;;  %v937_v32 = vld [vmem:[%s3551_s6 + $0x78] sm:$0xff]  ;;  %v926_v33 = vld [vmem:[%s3551_s6 + $0x20] sm:$0xff]  ;;  %v936_v16 = vld [vmem:[%s3551_s6 + $0x70] sm:$0xff] }
 0x12d   : > { %v933_v37 = vld [vmem:[%s3551_s6 + $0x58] sm:$0xff] }
 0x12e   : > { %v2915_v53 = vpack.c.bf16 %v738_v38, %v738_v38  ;;  %v1475_v38 = vld [vmem:[%s3553_s8 + $0x10] sm:$0xff] }
 0x132   : > { %v681_v24 = vpop.permute.xlu1 %680  ;;  %v661_v46 = vpop.permute.xlu2 %660 }
 0x133   : > { %v702_v25 = vsel %vm655_vm4, %v681_v24, 0.0  ;;  %v732_v26 = vsel %vm2856_vm3, %v681_v24, 0.0  ;;  %v728_v57 = vsel %vm2856_vm3, %v661_v46, 0.0  ;;  %v698_v60 = vsel %vm655_vm4, %v661_v46, 0.0  ;;  %v1474_v46 = vld [vmem:[%s3553_s8 + $0x8] sm:$0xff] }
 0x134   : > { %v710_v28 = vadd.f32 %v702_v25, %v508_v21  ;;  %v740_v29 = vadd.f32 %v732_v26, %v516_v22  ;;  %v736_v61 = vadd.f32 %v728_v57, %v512_v56  ;;  %v706_v2 = vadd.f32 %v698_v60, %v504_v59  ;;  %v1480_v56 = vld [vmem:[%s3553_s8 + $0x38] sm:$0xff]  ;;  %v1485_v60 = vld [vmem:[%s3553_s8 + $0x60] sm:$0xff] }
 0x136   : > { %v2148_v30 = vpack.c.bf16 %v711_v23, %v710_v28  ;;  %v2888_v31 = vpack.c.bf16 %v740_v29, %v740_v29  ;;  %v2936_v7 = vpack.c.bf16 %v736_v61, %v736_v61  ;;  %v2313_v8 = vpack.i.bf16 %v711_v23, %v710_v28  ;;  %v929_v28 = vld [vmem:[%s3551_s6 + $0x38] sm:$0xff]  ;;  %v922_v29 = vld [vmem:[%s3551_s6] sm:$0xff] }
 0x138   : > { %2197 = vst [vmem:[#allocation2 + $0x30] sm:$0xff] %v2148_v30   ;;  %857 = vrot.lane.b32.xlu2 %v2888_v31, %s2533_s13  ;;  %v924_v30 = vld [vmem:[%s3551_s6 + $0x10] sm:$0xff] }
 0x139   : > { %v696_v36 = vpop.permute.xlu0 %695 }
 0x13a   : > { %v705_v40 = vsel %vm655_vm4, %v696_v36, 0.0  ;;  %v735_v41 = vsel %vm2856_vm3, %v696_v36, 0.0  ;;  %v931_v36 = vld [vmem:[%s3551_s6 + $0x48] sm:$0xff] }
 0x13b   : > { %v676_v42 = vpop.permute.xlu1 %675  ;;  %v713_v43 = vadd.f32 %v705_v40, %v511_v34  ;;  %v743_v44 = vadd.f32 %v735_v41, %v519_v35  ;;  %v925_v34 = vld [vmem:[%s3551_s6 + $0x18] sm:$0xff]  ;;  %v934_v35 = vld [vmem:[%s3551_s6 + $0x60] sm:$0xff] }
 0x13c   : > { %v701_v45 = vsel %vm655_vm4, %v676_v42, 0.0  ;;  %v731_v5 = vsel %vm2856_vm3, %v676_v42, 0.0  ;;  %v1473_v41 = vld [vmem:[%s3553_s8] sm:$0xff] }
 0x13d   : > { %v709_v48 = vadd.f32 %v701_v45, %v507_v39  ;;  %v2153_v49 = vpack.c.bf16 %v713_v43, %v712_v17  ;;  %v2910_v50 = vpack.c.bf16 %v743_v44, %v743_v44  ;;  %v2308_v54 = vpack.i.bf16 %v713_v43, %v712_v17  ;;  %v935_v39 = vld [vmem:[%s3551_s6 + $0x68] sm:$0xff]  ;;  %v930_v42 = vld [vmem:[%s3551_s6 + $0x40] sm:$0xff]  ;;  %v1476_v44 = vld [vmem:[%s3553_s8 + $0x18] sm:$0xff] }
 0x13e   : > { %v739_v12 = vadd.f32 %v731_v5, %v515_v4  ;;  %v1478_v17 = vld [vmem:[%s3553_s8 + $0x28] sm:$0xff]  ;;  %v1481_v45 = vld [vmem:[%s3553_s8 + $0x40] sm:$0xff]  ;;  %v1488_v4 = vld [vmem:[%s3553_s8 + $0x78] sm:$0xff] }
 0x13f   : > { %v2143_v55 = vpack.c.bf16 %v709_v48, %v708_v47  ;;  %2198 = vst [vmem:[#allocation2 + $0x38] sm:$0xff] %v2153_v49   ;;  %863 = vrot.lane.b32.xlu1 %v2910_v50, %s2533_s13  ;;  %2309 = vrot.lane.b32.xlu0 %v2308_v54, %s2534_s28  ;;  %v2121_v13 = vld [vmem:[#allocation2 + $0x30] sm:$0xff]  ;;  %v2318_v21 = vpack.i.bf16 %v709_v48, %v708_v47  ;;  %v1484_v49 = vld [vmem:[%s3553_s8 + $0x58] sm:$0xff] }
 0x140   : > { %853 = vrot.lane.b32.xlu2 %v2915_v53, %s2533_s13  ;;  %v2943_v18 = vpack.c.bf16 %v739_v12, %v739_v12  ;;  %v1479_v48 = vld [vmem:[%s3553_s8 + $0x30] sm:$0xff] }
 0x141   : > { %2196 = vst [vmem:[#allocation2 + $0x28] sm:$0xff] %v2143_v55   ;;  %v1487_v55 = vld [vmem:[%s3553_s8 + $0x70] sm:$0xff] }
 0x143   : > { %v666_v63 = vpop.permute.xlu1 %665 }
 0x144   : > { %v699_v0 = vsel %vm655_vm4, %v666_v63, 0.0  ;;  %v729_v20 = vsel %vm2856_vm3, %v666_v63, 0.0 }
 0x145   : > { %v707_v3 = vadd.f32 %v699_v0, %v505_v62  ;;  %v737_v23 = vadd.f32 %v729_v20, %v513_v19  ;;  %v1483_v62 = vld [vmem:[%s3553_s8 + $0x50] sm:$0xff] }
 0x146   : > { %v2122_v9 = vld [vmem:[#allocation2 + $0x38] sm:$0xff] }
 0x147   : > { %v2138_v10 = vpack.c.bf16 %v707_v3, %v706_v2  ;;  %859 = vrot.lane.b32.xlu1 %v2931_v1, %s2533_s13  ;;  %2314 = vrot.lane.b32.xlu0 %v2313_v8, %s2534_s28  ;;  %v2951_v25 = vpack.c.bf16 %v737_v23, %v737_v23  ;;  %v2323_v26 = vpack.i.bf16 %v707_v3, %v706_v2 }
 0x148   : > { %849 = vrot.lane.b32.xlu2 %v2936_v7, %s2533_s13  ;;  %1187 = vmatpush.bf16.msra.mxu0 %v2122_v9  ;;  %v2120_v22 = vld [vmem:[#allocation2 + $0x28] sm:$0xff] }
 0x149   : > { %2195 = vst [vmem:[#allocation2 + $0x20] sm:$0xff] %v2138_v10   ;;  %2206 = vmatpush.bf16.msra.mxu3 %v2122_v9 }
 0x14c   : > { %1188 = vmatpush.bf16.msra.mxu0 %v2121_v13 }
 0x14d   : > { %2207 = vmatpush.bf16.msra.mxu3 %v2121_v13 }
 0x14f   : > { %855 = vrot.lane.b32.xlu1 %v2943_v18, %s2533_s13  ;;  %2319 = vrot.lane.b32.xlu0 %v2318_v21, %s2534_s28 }
 0x150   : > { %2334 = vrot.lane.b32.xlu2 %v2313_v8, %s2535_s21  ;;  %1189 = vmatpush.bf16.msra.mxu0 %v2120_v22  ;;  %v2119_v24 = vld [vmem:[#allocation2 + $0x20] sm:$0xff]  ;;  %v1486_v8 = vld [vmem:[%s3553_s8 + $0x68] sm:$0xff] }
 0x151   : > { %2208 = vmatpush.bf16.msra.mxu3 %v2120_v22 }
 0x154   : > { %1190 = vmatpush.bf16.msra.mxu0 %v2119_v24 }
 0x155   : > { %2209 = vmatpush.bf16.msra.mxu3 %v2119_v24 }
 0x157   : > { %851 = vrot.lane.b32.xlu1 %v2951_v25, %s2533_s13  ;;  %2324 = vrot.lane.b32.xlu0 %v2323_v26, %s2534_s28  ;;  %s1715_s13 = scalar_lea.sflag [#allocation5], %s2868_s0  ;;  %s2418_s28 = sshra.s32 %s1736_s16, 4  ;;  %s2419_s28 = int_to_ptr.hbm [resolvable:$true] %s2418_s28 }
 0x158   : > { %970 = vperm.xlu2 %2305, %v928_v6   ;;  %s2420_s22 = scalar_lea.hbm %s2419_s28, 64  ;;  %p2425_p6 = scmp.lt.s32.totalorder %s2419_s28, %s3554_s9 }
 0x159   : > { %p2421_p3 = scmp.ne.s32.totalorder %s2419_s28, %s2420_s22 }
 0x15b   : > { %p2422_p4 = pnand %p2421_p3, %p2654_p8 }
 0x15d   : > { %p2423_p5 = pneg %p2422_p4 }
 0x15f   : > { %2339 = vrot.lane.b32.xlu1 %v2318_v21, %s2535_s21  ;;  %2329 = vrot.lane.b32.xlu0 %v2308_v54, %s2535_s21  ;;  %v1482_v54 = vld [vmem:[%s3553_s8 + $0x48] sm:$0xff] }
 0x160   : > { %965 = vperm.xlu2 %2305, %v927_v27  }
 0x167   : > { %975 = vperm.xlu1 %2307, %v929_v28   ;;  %2344 = vrot.lane.b32.xlu0 %v2323_v26, %s2535_s21  ;;  %s2424_s21 = scalar_lea.hbm %s3554_s9, 256 }
 0x168   : > { %940 = vperm.xlu2 %2305, %v922_v29   ;;  %p2426_p7 = scmp.lt.s32.totalorder %s2424_s21, %s2420_s22 }
 0x16a   : > { %p2427_p10 = por %p2426_p7, %p2425_p6 }
 0x16c   : > { %p2428_p11 = pnand %p2427_p10, %p2423_p5 }
 0x16f   : > { %950 = vperm.xlu1 %2307, %v924_v30   ;;  %960 = vperm.xlu0 %2306, %v926_v33  }
 0x170   : > { %1015 = vperm.xlu2 %2305, %v937_v32  }
 0x177   : > { %945 = vperm.xlu1 %2307, %v923_v14   ;;  %955 = vperm.xlu0 %2306, %v925_v34  }
 0x178   : > { %990 = vperm.xlu2 %2305, %v932_v15  }
 0x179   : > { %v862_v40 = vpop.permute.xlu2 %861 }
 0x17f   : > { %1000 = vperm.xlu1 %2307, %v934_v35   ;;  %1010 = vperm.xlu0 %2306, %v936_v16  }
 0x180   : > { %985 = vperm.xlu2 %2305, %v931_v36  }
 0x187   : > { %995 = vperm.xlu1 %2307, %v933_v37   ;;  %1005 = vperm.xlu0 %2306, %v935_v39   ;;  %v2099_v37 = vld [vmem:[%s3550_s5 + $0x4] sm:$0xf] }
 0x188   : > { %1501 = vperm.xlu2 %2305, %v1475_v38   ;;  %v1927_v38 = vld [vmem:[%s3550_s5 + $0x8] sm:$0xf0] }
 0x18f   : > { %1491 = vperm.xlu1 %2307, %v1473_v41   ;;  %980 = vperm.xlu0 %2306, %v930_v42  }
 0x190   : > { %1516 = vperm.xlu2 %2305, %v1478_v17  }
 0x192   : > { %v858_v43 = vpop.permute.xlu2 %857 }
 0x197   : > { %1506 = vperm.xlu1 %2307, %v1476_v44   ;;  %1496 = vperm.xlu0 %2306, %v1474_v46   ;;  %v1973_v46 = vld [vmem:[%s3550_s5 + $0x60] sm:$0xf] }
 0x198   : > { %1531 = vperm.xlu2 %2305, %v1481_v45  }
 0x19a   : > { %v854_v47 = vpop.permute.xlu2 %853 }
 0x19f   : > { %1521 = vperm.xlu1 %2307, %v1479_v48   ;;  %1511 = vperm.xlu0 %2306, %v1477_v51  }
 0x1a0   : > { %1546 = vperm.xlu2 %2305, %v1484_v49  }
 0x1a2   : > { %v850_v52 = vpop.permute.xlu2 %849 }
 0x1a7   : > { %1536 = vperm.xlu1 %2307, %v1482_v54   ;;  %1526 = vperm.xlu0 %2306, %v1480_v56   ;;  %v1943_v54 = vld [vmem:[%s3550_s5 + $0x28] sm:$0xf0]  ;;  %v1933_v56 = vld [vmem:[%s3550_s5 + $0x10] sm:$0xf] }
 0x1a8   : > { %1561 = vperm.xlu2 %2305, %v1487_v55  }
 0x1aa   : > { %v2335_v57 = vpop.permute.xlu2 %2334 }
 0x1ab   : > { %v2337_v58 = vunpack.i.h.bf16 %v2335_v57  ;;  %v2336_v59 = vunpack.i.l.bf16 %v2335_v57  ;;  %v2102_v57 = vld [vmem:[%s3550_s5 + $0x14] sm:$0xf0] }
 0x1ad   : > { %v2168_v61 = vpack.c.bf16 %v2337_v58, %v2336_v59  ;;  %v1981_v58 = vld [vmem:[%s3550_s5 + $0x70] sm:$0xf]  ;;  %v2114_v59 = vld [vmem:[%s3550_s5 + $0x74] sm:$0xf0] }
 0x1af   : > { %2200 = vst [vmem:[#allocation2 + $0x10] sm:$0xff] %v2168_v61   ;;  %1551 = vperm.xlu1 %2307, %v1485_v60   ;;  %1541 = vperm.xlu0 %2306, %v1483_v62   ;;  %v1934_v60 = vor.u32 %v2102_v57, %v1933_v56  ;;  %v1982_v61 = vor.u32 %v2114_v59, %v1981_v58  ;;  %v2105_v62 = vld [vmem:[%s3550_s5 + $0x34] sm:$0xf] }
 0x1b0   : > { %805 = vst.msk [vmem:[#allocation2 + $0x10] sm:$0xf] %vm800_vm5, %v2888_v31 }
 0x1b1   : > { %806 = vst.msk [vmem:[#allocation2 + $0x14] sm:$0xf] %vm800_vm5, %v2931_v1  ;;  %v864_v63 = vpop.permute.xlu1 %863  ;;  %v2310_v0 = vpop.permute.xlu0 %2309 }
 0x1b2   : > { %v2312_v2 = vunpack.i.h.bf16 %v2310_v0  ;;  %v2311_v3 = vunpack.i.l.bf16 %v2310_v0 }
 0x1b4   : > { %v2193_v5 = vpack.c.bf16 %v2312_v2, %v2311_v3  ;;  %v1941_v2 = vld [vmem:[%s3550_s5 + $0x20] sm:$0xf]  ;;  %v2104_v3 = vld [vmem:[%s3550_s5 + $0x24] sm:$0xf0] }
 0x1b6   : > { %2205 = vst [vmem:[#allocation2 + $0x58] sm:$0xff] %v2193_v5   ;;  %v1983_v5 = vld [vmem:[%s3550_s5 + $0x78] sm:$0xf0] }
 0x1b7   : > { %1566 = vperm.xlu1 %2307, %v1488_v4   ;;  %880 = vst.msk [vmem:[#allocation2 + $0x58] sm:$0xf] %vm873_vm6, %v862_v40  ;;  %1556 = vperm.xlu0 %2306, %v1486_v8   ;;  %v1930_v40 = vor.u32 %v2099_v37, %v1927_v38  ;;  %v2113_v4 = vld [vmem:[%s3550_s5 + $0x74] sm:$0xf]  ;;  %v1942_v8 = vor.u32 %v2104_v3, %v1941_v2 }
 0x1b8   : > { %881 = vst.msk [vmem:[#allocation2 + $0x5c] sm:$0xf] %vm873_vm6, %v864_v63  ;;  %v1951_v63 = vld [vmem:[%s3550_s5 + $0x38] sm:$0xf0] }
 0x1b9   : > { %v860_v31 = vpop.permute.xlu1 %859  ;;  %v2315_v1 = vpop.permute.xlu0 %2314  ;;  %v1954_v0 = vor.u32 %v2105_v62, %v1951_v63 }
 0x1ba   : > { %v2317_v9 = vunpack.i.h.bf16 %v2315_v1  ;;  %v2316_v10 = vunpack.i.l.bf16 %v2315_v1  ;;  %v2107_v1 = vld [vmem:[%s3550_s5 + $0x44] sm:$0xf] }
 0x1bc   : > { %v2188_v12 = vpack.c.bf16 %v2317_v9, %v2316_v10  ;;  %v1959_v9 = vld [vmem:[%s3550_s5 + $0x48] sm:$0xf0] }
 0x1bd   : > { %v1962_v10 = vor.u32 %v2107_v1, %v1959_v9 }
 0x1be   : > { %2204 = vst [vmem:[#allocation2 + $0x50] sm:$0xff] %v2188_v12   ;;  %v1949_v12 = vld [vmem:[%s3550_s5 + $0x30] sm:$0xf] }
 0x1bf   : > { %878 = vst.msk [vmem:[#allocation2 + $0x50] sm:$0xf] %vm873_vm6, %v858_v43  ;;  %v3059_v13 = vld [vmem:[#allocation2 + $0x58] sm:$0xff] }
 0x1c0   : > { %879 = vst.msk [vmem:[#allocation2 + $0x54] sm:$0xf] %vm873_vm6, %v860_v31  ;;  %1240 = vmatpush.bf16.msra.mxu1 %v3059_v13  ;;  %v1986_v31 = vor.u32 %v2113_v4, %v1983_v5 }
 0x1c1   : > { %v856_v19 = vpop.permute.xlu1 %855  ;;  %v2320_v20 = vpop.permute.xlu0 %2319 }
 0x1c2   : > { %v2322_v21 = vunpack.i.h.bf16 %v2320_v20  ;;  %v2321_v22 = vunpack.i.l.bf16 %v2320_v20  ;;  %v2109_v20 = vld [vmem:[%s3550_s5 + $0x54] sm:$0xf] }
 0x1c4   : > { %v2183_v23 = vpack.c.bf16 %v2322_v21, %v2321_v22  ;;  %v1967_v21 = vld [vmem:[%s3550_s5 + $0x58] sm:$0xf0] }
 0x1c5   : > { %v1970_v22 = vor.u32 %v2109_v20, %v1967_v21 }
 0x1c6   : > { %2203 = vst [vmem:[#allocation2 + $0x48] sm:$0xff] %v2183_v23   ;;  %v1957_v23 = vld [vmem:[%s3550_s5 + $0x40] sm:$0xf] }
 0x1c7   : > { %876 = vst.msk [vmem:[#allocation2 + $0x48] sm:$0xf] %vm873_vm6, %v854_v47  ;;  %v3064_v24 = vld [vmem:[#allocation2 + $0x50] sm:$0xff]  ;;  %v2112_v47 = vld [vmem:[%s3550_s5 + $0x64] sm:$0xf0] }
 0x1c8   : > { %877 = vst.msk [vmem:[#allocation2 + $0x4c] sm:$0xf] %vm873_vm6, %v856_v19  ;;  %1241 = vmatpush.bf16.msra.mxu1 %v3064_v24  ;;  %v1974_v51 = vor.u32 %v2112_v47, %v1973_v46 }
 0x1c9   : > { %v852_v6 = vpop.permute.xlu1 %851  ;;  %v2325_v26 = vpop.permute.xlu0 %2324 }
 0x1ca   : > { %v2327_v27 = vunpack.i.h.bf16 %v2325_v26  ;;  %v2326_v28 = vunpack.i.l.bf16 %v2325_v26  ;;  %v2111_v26 = vld [vmem:[%s3550_s5 + $0x64] sm:$0xf] }
 0x1cc   : > { %v2178_v29 = vpack.c.bf16 %v2327_v27, %v2326_v28  ;;  %v1975_v27 = vld [vmem:[%s3550_s5 + $0x68] sm:$0xf0] }
 0x1cd   : > { %v1978_v28 = vor.u32 %v2111_v26, %v1975_v27 }
 0x1ce   : > { %2202 = vst [vmem:[#allocation2 + $0x40] sm:$0xff] %v2178_v29   ;;  %v1965_v29 = vld [vmem:[%s3550_s5 + $0x50] sm:$0xf] }
 0x1cf   : > { %874 = vst.msk [vmem:[#allocation2 + $0x40] sm:$0xf] %vm873_vm6, %v850_v52  ;;  %v2124_v30 = vld [vmem:[#allocation2 + $0x48] sm:$0xff]  ;;  %v2103_v52 = vld [vmem:[%s3550_s5 + $0x24] sm:$0xf] }
 0x1d0   : > { %875 = vst.msk [vmem:[#allocation2 + $0x44] sm:$0xf] %vm873_vm6, %v852_v6  ;;  %1242 = vmatpush.bf16.msra.mxu1 %v2124_v30  ;;  %v1946_v55 = vor.u32 %v2103_v52, %v1943_v54 }
 0x1d1   : > { %v2340_v32 = vpop.permute.xlu1 %2339  ;;  %v2330_v15 = vpop.permute.xlu0 %2329 }
 0x1d2   : > { %v2342_v33 = vunpack.i.h.bf16 %v2340_v32  ;;  %v2341_v14 = vunpack.i.l.bf16 %v2340_v32  ;;  %v2332_v34 = vunpack.i.h.bf16 %v2330_v15  ;;  %v2331_v35 = vunpack.i.l.bf16 %v2330_v15 }
 0x1d4   : > { %v2163_v36 = vpack.c.bf16 %v2342_v33, %v2341_v14  ;;  %v2173_v16 = vpack.c.bf16 %v2332_v34, %v2331_v35  ;;  %v971_v14 = vpop.permute.xlu2 %970 }
 0x1d6   : > { %2199 = vst [vmem:[#allocation2 + $0x8] sm:$0xff] %v2163_v36  }
 0x1d7   : > { %803 = vst.msk [vmem:[#allocation2 + $0x8] sm:$0xf] %vm800_vm5, %v2915_v53  ;;  %v2123_v39 = vld [vmem:[#allocation2 + $0x40] sm:$0xff] }
 0x1d8   : > { %804 = vst.msk [vmem:[#allocation2 + $0xc] sm:$0xf] %vm800_vm5, %v2943_v18  ;;  %1243 = vmatpush.bf16.msra.mxu1 %v2123_v39  ;;  %v1935_v18 = vld [vmem:[%s3550_s5 + $0x18] sm:$0xf0] }
 0x1d9   : > { %2201 = vst [vmem:[#allocation2 + $0x18] sm:$0xff] %v2173_v16   ;;  %v2345_v41 = vpop.permute.xlu0 %2344  ;;  %v3188_v16 = vpop.permute.xlu1 %975 }
 0x1da   : > { %807 = vst.msk [vmem:[#allocation2 + $0x18] sm:$0xf] %vm800_vm5, %v2863_v11  ;;  %v2347_v17 = vunpack.i.h.bf16 %v2345_v41  ;;  %v2346_v42 = vunpack.i.l.bf16 %v2345_v41  ;;  %v2117_v11 = vld [vmem:[#allocation2 + $0x10] sm:$0xff] }
 0x1db   : > { %808 = vst.msk [vmem:[#allocation2 + $0x1c] sm:$0xf] %vm800_vm5, %v2910_v50  ;;  %2035 = vmatmul.msk.bf16.vlgmr.msra.gmra.mxu1 %vm1162_vm7, %v1930_v40  ;;  %v2101_v50 = vld [vmem:[%s3550_s5 + $0x14] sm:$0xf] }
 0x1dc   : > { %v2158_v43 = vpack.c.bf16 %v2347_v17, %v2346_v42  ;;  %v1938_v44 = vor.u32 %v2101_v50, %v1935_v18  ;;  %v966_v34 = vpop.permute.xlu2 %965 }
 0x1de   : > { %2159 = vst [vmem:[#allocation2] sm:$0xff] %v2158_v43  }
 0x1df   : > { %801 = vst.msk [vmem:[#allocation2] sm:$0xf] %vm800_vm5, %v2936_v7  ;;  %v2116_v45 = vld [vmem:[#allocation2 + $0x8] sm:$0xff]  ;;  %v1925_v7 = vld [vmem:[%s3550_s5] sm:$0xf] }
 0x1e0   : > { %802 = vst.msk [vmem:[#allocation2 + $0x4] sm:$0xf] %vm800_vm5, %v2951_v25  ;;  %v2100_v25 = vld [vmem:[%s3550_s5 + $0x4] sm:$0xf0] }
 0x1e1   : > { %v1926_v49 = vor.u32 %v2100_v25, %v1925_v7  ;;  %v951_v17 = vpop.permute.xlu1 %950  ;;  %v961_v7 = vpop.permute.xlu0 %960 }
 0x1e2   : > { %v2118_v53 = vld [vmem:[#allocation2 + $0x18] sm:$0xff] }
 0x1e3   : > { %1191 = vmatpush.bf16.msra.mxu0 %v2118_v53  ;;  %2210 = vmatpush.bf16.msra.mxu3 %v2118_v53 }
 0x1e4   : > { %v941_v36 = vpop.permute.xlu2 %940 }
 0x1e7   : > { %1192 = vmatpush.bf16.msra.mxu0 %v2117_v11  ;;  %2211 = vmatpush.bf16.msra.mxu3 %v2117_v11  ;;  %v2115_v48 = vld [vmem:[#allocation2] sm:$0xff] }
 0x1e9   : > { %v946_v11 = vpop.permute.xlu1 %945 }
 0x1eb   : > { %1193 = vmatpush.bf16.msra.mxu0 %v2116_v45  ;;  %2212 = vmatpush.bf16.msra.mxu3 %v2116_v45 }
 0x1ec   : > { %2036 = vmatmul.msk.bf16.gmra.mxu1 %vm1162_vm7, %v1938_v44 }
 0x1ef   : > { %1194 = vmatpush.bf16.msra.mxu0 %v2115_v48  ;;  %2213 = vmatpush.bf16.msra.mxu3 %v2115_v48 }
 0x1f2   : > { %1195 = vmatmul.bf16.vlgmr.msra.gmra.mxu0 %v1926_v49  ;;  %1225 = vmatmul.bf16.vlgmr.msra.gmra.mxu3 %v1974_v51 }
 0x1f3   : > { %2214 = vmatpush.bf16.msrb.mxu3 %v3059_v13  ;;  %v2106_v13 = vld [vmem:[%s3550_s5 + $0x34] sm:$0xf0] }
 0x1f4   : > { %v1950_v19 = vor.u32 %v2106_v13, %v1949_v12 }
 0x1f7   : > { %2215 = vmatpush.bf16.msrb.mxu3 %v3064_v24  ;;  %v2108_v24 = vld [vmem:[%s3550_s5 + $0x44] sm:$0xf0] }
 0x1f8   : > { %v1958_v6 = vor.u32 %v2108_v24, %v1957_v23 }
 0x1fb   : > { %2216 = vmatpush.bf16.msrb.mxu3 %v2124_v30  ;;  %v2110_v30 = vld [vmem:[%s3550_s5 + $0x54] sm:$0xf0] }
 0x1fc   : > { %2037 = vmatmul.msk.bf16.gmra.mxu1 %vm1162_vm7, %v1946_v55  ;;  %v1966_v32 = vor.u32 %v2110_v30, %v1965_v29  ;;  %v956_v55 = vpop.permute.xlu0 %955 }
 0x1ff   : > { %2217 = vmatpush.bf16.msrb.mxu3 %v2123_v39 }
 0x202   : > { %1200 = vmatmul.bf16.gmra.mxu0 %v1934_v60  ;;  %1230 = vmatmul.bf16.gmra.mxu3 %v1982_v61 }
 0x204   : > { %v3203_v9 = vpop.permute.xlu0 %1010 }
 0x20c   : > { %2038 = vmatmul.msk.bf16.gmra.mxu1 %vm1162_vm7, %v1954_v0 }
 0x212   : > { %1205 = vmatmul.bf16.gmra.mxu0 %v1942_v8  ;;  %2042 = vmatmul.msk.bf16.vlgmr.msrb.gmra.mxu3 %vm1162_vm7, %v1986_v31 }
 0x21c   : > { %2039 = vmatmul.msk.bf16.gmra.mxu1 %vm1162_vm7, %v1962_v10 }
 0x222   : > { %1210 = vmatmul.bf16.gmra.mxu0 %v1950_v19 }
 0x22c   : > { %2040 = vmatmul.msk.bf16.gmra.mxu1 %vm1162_vm7, %v1970_v22 }
 0x232   : > { %1215 = vmatmul.bf16.gmra.mxu0 %v1958_v6  ;;  %v1016_v6 = vpop.permute.xlu2 %1015 }
 0x23c   : > { %2041 = vmatmul.msk.bf16.gmra.mxu1 %vm1162_vm7, %v1978_v28 }
 0x242   : > { %1220 = vmatmul.bf16.gmra.mxu0 %v1966_v32  ;;  %v1006_v32 = vpop.permute.xlu0 %1005 }
 0x258   : > { %v1245_v33 = vpop.f32.mrf.mxu1 }
 0x260   : > { %v1247_v15 = vpop.f32.mrf.mxu1 }
 0x269   : > { %v1250_v35 = vpop.f32.mrf.mxu1 }
 0x26f   : > { %v1196_v37 = vpop.f32.mrf.mxu0 }
 0x270   : > { %v1197_v38 = vadd.f32 %v1196_v37, %v941_v36 }
 0x271   : > { %v1252_v39 = vpop.f32.mrf.mxu1 }
 0x272   : > { %v1246_v40 = vadd.f32 %v1245_v33, %v1197_v38 }
 0x274   : > { %v2043_v46 = vmul.f32 -1.442695, %v1246_v40 }
 0x275   : > { %v3190_v50 = vpop.f32.mrf.mxu3 }
 0x276   : > { %2348 = vpow2.f32 %v2043_v46 }
 0x277   : > { %v1198_v41 = vpop.f32.mrf.mxu0 }
 0x278   : > { %v1199_v18 = vadd.f32 %v1198_v41, %v946_v11 }
 0x279   : > { %v1255_v42 = vpop.f32.mrf.mxu1 }
 0x27a   : > { %v1248_v45 = vadd.f32 %v1247_v15, %v1199_v18 }
 0x27c   : > { %v2044_v47 = vmul.f32 -1.442695, %v1248_v45  ;;  %v2349_v56 = vpop.eup %2348 }
 0x27d   : > { %v3192_v48 = vpop.f32.mrf.mxu3  ;;  %v3194_v60 = vadd.f32 1.0, %v2349_v56 }
 0x27e   : > { %2350 = vpow2.f32 %v2044_v47 }
 0x27f   : > { %v1201_v43 = vpop.f32.mrf.mxu0  ;;  %2352 = vrcp.f32 %v3194_v60  ;;  %v1328_v46 = vand.u32 2147483648, %v3194_v60  ;;  %vm1322_vm9 = vweird.f32 %v3194_v60 }
 0x280   : > { %v1202_v51 = vadd.f32 %v1201_v43, %v951_v17  ;;  %v3229_v43 = vpop.permute.xlu2 %990 }
 0x281   : > { %v1257_v53 = vpop.f32.mrf.mxu1 }
 0x282   : > { %v1251_v57 = vadd.f32 %v1250_v35, %v1202_v51 }
 0x284   : > { %v2351_v58 = vpop.eup %2350  ;;  %v2045_v62 = vmul.f32 -1.442695, %v1251_v57 }
 0x285   : > { %v3196_v63 = vpop.f32.mrf.mxu3  ;;  %v3198_v3 = vadd.f32 1.0, %v2351_v58  ;;  %v3206_v19 = vpop.eup %2352 }
 0x286   : > { %2354 = vpow2.f32 %v2045_v62  ;;  %v1318_v30 = vmul.f32 %v3206_v19, %v3194_v60  ;;  %vm1323_vm8 = vweird.f32 %v3206_v19 }
 0x287   : > { %v1203_v44 = vpop.f32.mrf.mxu0  ;;  %2356 = vrcp.f32 %v3198_v3  ;;  %vm3275_vm12 = vmor %vm1322_vm9, %vm1323_vm8  ;;  %vm1337_vm13 = vweird.f32 %v3198_v3 }
 0x288   : > { %v1204_v0 = vadd.f32 %v1203_v44, %v956_v55 }
 0x289   : > { %v1260_v25 = vpop.f32.mrf.mxu1 }
 0x28a   : > { %v1253_v31 = vadd.f32 %v1252_v39, %v1204_v0  ;;  %v1319_v39 = vsub.f32 1.0, %v1318_v30  ;;  %v1329_v0 = vor.u32 1.1754944e-38, %v1328_v46 }
 0x28c   : > { %v2046_v12 = vmul.f32 -1.442695, %v1253_v31  ;;  %v2355_v21 = vpop.eup %2354  ;;  %v1320_v11 = vmul.f32 %v3206_v19, %v1319_v39 }
 0x28d   : > { %v3210_v22 = vpop.f32.mrf.mxu3  ;;  %v3212_v24 = vpop.eup %2356  ;;  %v3214_v29 = vadd.f32 1.0, %v2355_v21 }
 0x28e   : > { %v1333_v15 = vmul.f32 %v3212_v24, %v3198_v3  ;;  %v1321_v56 = vadd.f32 %v3206_v19, %v1320_v11  ;;  %vm1338_vm10 = vweird.f32 %v3212_v24  ;;  %v1234_v31 = vadd.f32 %v3210_v22, %v1016_v6 }
 0x28f   : > { %v1206_v49 = vpop.f32.mrf.mxu0  ;;  %vm3291_vm14 = vmor %vm1337_vm13, %vm1338_vm10 }
 0x290   : > { %v1207_v54 = vadd.f32 %v1206_v49, %v961_v7  ;;  %v1334_v40 = vsub.f32 1.0, %v1333_v15  ;;  %v1001_v7 = vpop.permute.xlu1 %1000  ;;  %v981_v49 = vpop.permute.xlu0 %980 }
 0x291   : > { %v1262_v52 = vpop.f32.mrf.mxu1  ;;  %v3246_v51 = vadd.f32 %v3190_v50, %v1001_v7 }
 0x292   : > { %v1256_v59 = vadd.f32 %v1255_v42, %v1207_v54  ;;  %v1335_v44 = vmul.f32 %v3212_v24, %v1334_v40  ;;  %v3252_v54 = vadd.f32 %v3192_v48, %v1006_v32  ;;  %v1232_v48 = vadd.f32 %v3196_v63, %v3203_v9 }
 0x293   : > { %v1341_v63 = vand.u32 2147483647, %v3198_v3 }
 0x294   : > { %v2047_v5 = vmul.f32 -1.442695, %v1256_v59  ;;  %v1336_v50 = vadd.f32 %v3212_v24, %v1335_v44 }
 0x295   : > { %v1280_v17 = vpop.f32.mrf.mxu3  ;;  %vm1342_vm15 = vcmp.eq.f32.partialorder %v1341_v63, 8.507059e+37 }
 0x296   : > { %2358 = vpow2.f32 %v2047_v5  ;;  %v1281_v22 = vadd.f32 %v1280_v17, %v1232_v48  ;;  %v1340_v6 = vsel %vm3291_vm14, %v3212_v24, %v1336_v50 }
 0x297   : > { %v1208_v61 = vpop.f32.mrf.mxu0 }
 0x298   : > { %v1209_v2 = vadd.f32 %v1208_v61, %v966_v34 }
 0x299   : > { %v3200_v4 = vpop.f32.mrf.mxu1 }
 0x29a   : > { %v1258_v8 = vadd.f32 %v1257_v53, %v1209_v2 }
 0x29c   : > { %v2048_v1 = vmul.f32 -1.442695, %v1258_v8  ;;  %v2359_v26 = vpop.eup %2358  ;;  %v1343_v8 = vand.u32 2147483648, %v3198_v3  ;;  %v986_v3 = vpop.permute.xlu2 %985 }
 0x29d   : > { %v3218_v33 = vadd.f32 1.0, %v2359_v26 }
 0x29e   : > { %2360 = vpow2.f32 %v2048_v1  ;;  %v1282_v1 = vpop.f32.mrf.mxu3  ;;  %v1344_v15 = vor.u32 1.1754944e-38, %v1343_v8 }
 0x29f   : > { %v1211_v10 = vpop.f32.mrf.mxu0  ;;  %2362 = vpow2.f32 %v2046_v12  ;;  %v1325_v12 = vsel %vm3275_vm12, %v3206_v19, %v1321_v56  ;;  %v1283_v30 = vadd.f32 %v1282_v1, %v1234_v31  ;;  %v1386_v17 = vand.u32 2147483647, %v3218_v33 }
 0x2a0   : > { %v1212_v13 = vadd.f32 %v1211_v10, %v971_v14  ;;  %v1345_v40 = vsel %vm1342_vm15, %v1344_v15, %v1340_v6  ;;  %vm1382_vm1 = vweird.f32 %v3218_v33 }
 0x2a1   : > { %v3208_v20 = vpop.f32.mrf.mxu1 }
 0x2a2   : > { %v1261_v23 = vadd.f32 %v1260_v25, %v1212_v13  ;;  %v1326_v25 = vand.u32 2147483647, %v3194_v60 }
 0x2a4   : > { %v2049_v27 = vmul.f32 -1.442695, %v1261_v23  ;;  %v2361_v28 = vpop.eup %2360  ;;  %vm3267_vm11 = vcmp.eq.f32.partialorder %v1326_v25, 8.507059e+37 }
 0x2a5   : > { %v3223_v35 = vadd.f32 1.0, %v2361_v28  ;;  %v2363_v37 = vpop.eup %2362  ;;  %v1330_v39 = vsel %vm3267_vm11, %v1329_v0, %v1325_v12  ;;  %vm1352_vm11 = vweird.f32 %v3214_v29 }
 0x2a6   : > { %2364 = vpow2.f32 %v2049_v27  ;;  %v3231_v53 = vadd.f32 1.0, %v2363_v37 }
 0x2a7   : > { %v1213_v14 = vpop.f32.mrf.mxu0  ;;  %2366 = vrcp.f32 %v3214_v29  ;;  %vm1397_vm3 = vweird.f32 %v3223_v35 }
 0x2a8   : > { %v1214_v34 = vadd.f32 %v1213_v14, %v3188_v16  ;;  %2368 = vrcp.f32 %v3218_v33  ;;  %v1358_v14 = vand.u32 2147483648, %v3214_v29 }
 0x2a9   : > { %v3225_v36 = vpop.f32.mrf.mxu1  ;;  %2370 = vrcp.f32 %v3223_v35 }
 0x2aa   : > { %v1263_v38 = vadd.f32 %v1262_v52, %v1214_v34 }
 0x2ac   : > { %v2365_v41 = vpop.eup %2364  ;;  %v2050_v42 = vmul.f32 -1.442695, %v1263_v38 }
 0x2ad   : > { %v3234_v16 = vadd.f32 1.0, %v2365_v41  ;;  %v3239_v45 = vpop.eup %2366 }
 0x2ae   : > { %2372 = vpow2.f32 %v2050_v42  ;;  %v3243_v47 = vpop.eup %2368  ;;  %v1348_v58 = vmul.f32 %v3239_v45, %v3214_v29 }
 0x2af   : > { %2374 = vrcp.f32 %v3234_v16  ;;  %v1216_v18 = vpop.f32.mrf.mxu0  ;;  %v3256_v57 = vpop.eup %2370  ;;  %v1378_v61 = vmul.f32 %v3243_v47, %v3218_v33  ;;  %vm1383_vm2 = vweird.f32 %v3243_v47  ;;  %vm1412_vm4 = vweird.f32 %v3234_v16 }
 0x2b0   : > { %2376 = vrcp.f32 %v3231_v53  ;;  %v1217_v55 = vadd.f32 %v1216_v18, %v981_v49  ;;  %v1349_v23 = vsub.f32 1.0, %v1348_v58  ;;  %v1393_v28 = vmul.f32 %v3256_v57, %v3223_v35  ;;  %vm3352_vm14 = vmor %vm1382_vm1, %vm1383_vm2 }
 0x2b1   : > { %v3249_v52 = vpop.f32.mrf.mxu1  ;;  %v1379_v27 = vsub.f32 1.0, %v1378_v61  ;;  %v1388_v18 = vand.u32 2147483648, %v3218_v33  ;;  %v1418_v49 = vand.u32 2147483648, %v3234_v16  ;;  %v1416_v50 = vand.u32 2147483647, %v3234_v16 }
 0x2b2   : > { %v1266_v9 = vadd.f32 %v3200_v4, %v1217_v55  ;;  %v3311_v38 = vmul.f32 %v3239_v45, %v1349_v23  ;;  %v1403_v55 = vand.u32 2147483648, %v3223_v35  ;;  %vm1398_vm6 = vweird.f32 %v3256_v57 }
 0x2b3   : > { %v1380_v41 = vmul.f32 %v3243_v47, %v1379_v27  ;;  %vm1417_vm9 = vcmp.eq.f32.partialorder %v1416_v50, 8.507059e+37  ;;  %vm3364_vm15 = vmor %vm1397_vm3, %vm1398_vm6  ;;  %vm1387_vm1 = vcmp.eq.f32.partialorder %v1386_v17, 8.507059e+37  ;;  %v1373_v17 = vand.u32 2147483648, %v3231_v53 }
 0x2b4   : > { %v2373_v59 = vpop.eup %2372 }
 0x2b5   : > { %v3271_v2 = vpop.eup %2374  ;;  %v3273_v5 = vadd.f32 1.0, %v2373_v59  ;;  %v1381_v48 = vadd.f32 %v3243_v47, %v1380_v41 }
 0x2b6   : > { %v1408_v10 = vmul.f32 %v3271_v2, %v3234_v16  ;;  %v3295_v21 = vpop.eup %2376  ;;  %vm1413_vm0 = vweird.f32 %v3271_v2 }
 0x2b7   : > { %2378 = vrcp.f32 %v3273_v5  ;;  %v1218_v4 = vpop.f32.mrf.mxu0  ;;  %v3308_v24 = vmul.f32 %v3295_v21, %v3231_v53  ;;  %vm3329_vm5 = vmor %vm1412_vm4, %vm1413_vm0  ;;  %v1431_v60 = vand.u32 2147483647, %v3273_v5  ;;  %v1433_v63 = vand.u32 2147483648, %v3273_v5 }
 0x2b8   : > { %v1219_v26 = vadd.f32 %v1218_v4, %v986_v3  ;;  %v1409_v19 = vsub.f32 1.0, %v1408_v10  ;;  %2380 = vtanh.f32 %v1266_v9  ;;  %v1419_v10 = vor.u32 1.1754944e-38, %v1418_v49 }
 0x2b9   : > { %v1275_v32 = vpop.f32.mrf.mxu1  ;;  %2382 = vtanh.f32 %v1281_v22  ;;  %v1364_v7 = vsub.f32 1.0, %v3308_v24  ;;  %vm1427_vm10 = vweird.f32 %v3273_v5  ;;  %vm1432_vm13 = vcmp.eq.f32.partialorder %v1431_v60, 8.507059e+37 }
 0x2ba   : > { %v1268_v34 = vadd.f32 %v3208_v20, %v1219_v26  ;;  %v1410_v37 = vmul.f32 %v3271_v2, %v1409_v19  ;;  %v1394_v20 = vsub.f32 1.0, %v1393_v28  ;;  %v1276_v25 = vadd.f32 %v1275_v32, %v3246_v51  ;;  %v996_v26 = vpop.permute.xlu1 %995 }
 0x2bb   : > { %v1385_v28 = vsel %vm3352_vm14, %v3243_v47, %v1381_v48  ;;  %vm1353_vm0 = vweird.f32 %v3239_v45  ;;  %v1404_v24 = vor.u32 1.1754944e-38, %v1403_v55  ;;  %vm1368_vm3 = vweird.f32 %v3295_v21 }
 0x2bc   : > { %2384 = vtanh.f32 %v1268_v34  ;;  %v1411_v11 = vadd.f32 %v3271_v2, %v1410_v37  ;;  %v1395_v61 = vmul.f32 %v3256_v57, %v1394_v20  ;;  %vm3385_vm4 = vmor %vm1352_vm11, %vm1353_vm0  ;;  %v1359_v55 = vor.u32 1.1754944e-38, %v1358_v14  ;;  %v2129_v14 = vld [vmem:[%s3552_s7 + $0x10] sm:$0xff] }
 0x2bd   : > { %v2379_v42 = vpop.eup %2378  ;;  %2386 = vtanh.f32 %v1283_v30  ;;  %v1365_v30 = vmul.f32 %v3295_v21, %v1364_v7 }
 0x2be   : > { %v1423_v44 = vmul.f32 %v2379_v42, %v3273_v5  ;;  %v2381_v56 = vpop.eup %2380  ;;  %v1415_v0 = vsel %vm3329_vm5, %v3271_v2, %v1411_v11  ;;  %vm1428_vm8 = vweird.f32 %v2379_v42  ;;  %2388 = vtanh.f32 %v1276_v25 }
 0x2bf   : > { %v1221_v46 = vpop.f32.mrf.mxu0  ;;  %v2383_v51 = vpop.eup %2382  ;;  %v1445_v12 = vmul.f32 %v2381_v56, %v1330_v39  ;;  %v1396_v3 = vadd.f32 %v3256_v57, %v1395_v61  ;;  %v1420_v22 = vsel %vm1417_vm9, %v1419_v10, %v1415_v0  ;;  %vm1429_vm12 = vmor %vm1427_vm10, %vm1428_vm8  ;;  %v1401_v5 = vand.u32 2147483647, %v3223_v35  ;;  %v2132_v0 = vld [vmem:[%s3552_s7 + $0x28] sm:$0xff] }
 0x2c0   : > { %v1424_v59 = vsub.f32 1.0, %v1423_v44  ;;  %v1222_v16 = vadd.f32 %v1221_v46, %v3229_v43  ;;  %v1434_v43 = vor.u32 1.1754944e-38, %v1433_v63  ;;  %v1451_v15 = vmul.f32 %v2383_v51, %v1420_v22  ;;  %v2130_v51 = vld [vmem:[%s3552_s7 + $0x18] sm:$0xff]  ;;  %v1502_v63 = vpop.permute.xlu2 %1501 }
 0x2c1   : > { %v1277_v62 = vpop.f32.mrf.mxu1  ;;  %v1400_v37 = vsel %vm3364_vm15, %v3256_v57, %v1396_v3  ;;  %v1389_v35 = vor.u32 1.1754944e-38, %v1388_v18  ;;  %v1351_v39 = vadd.f32 %v3239_v45, %v3311_v38  ;;  %vm1402_vm2 = vcmp.eq.f32.partialorder %v1401_v5, 8.507059e+37  ;;  %v1497_v5 = vpop.permute.xlu0 %1496 }
 0x2c2   : > { %v2385_v8 = vpop.eup %2384  ;;  %v1278_v31 = vadd.f32 %v1277_v62, %v3252_v54  ;;  %v1425_v1 = vmul.f32 %v2379_v42, %v1424_v59  ;;  %v1271_v4 = vadd.f32 %v3225_v36, %v1222_v16  ;;  %v1405_v11 = vsel %vm1402_vm2, %v1404_v24, %v1400_v37  ;;  %v2131_v62 = vld [vmem:[%s3552_s7 + $0x20] sm:$0xff]  ;;  %v1492_v60 = vpop.permute.xlu1 %1491 }
 0x2c3   : > { %v2387_v9 = vpop.eup %2386  ;;  %v1446_v13 = vmul.f32 %v2385_v8, %v1345_v40  ;;  %v1366_v44 = vadd.f32 %v3295_v21, %v1365_v30  ;;  %v1356_v38 = vand.u32 2147483647, %v3214_v29  ;;  %vm1367_vm5 = vweird.f32 %v3231_v53  ;;  %v2134_v29 = vld [vmem:[%s3552_s7 + $0x38] sm:$0xff]  ;;  %v2133_v8 = vld [vmem:[%s3552_s7 + $0x30] sm:$0xff]  ;;  %v2397_v30 = vld [vmem:[%s2877_s18 + $0x8] sm:$0xff] }
 0x2c4   : > { %v1426_v2 = vadd.f32 %v2379_v42, %v1425_v1  ;;  %2390 = vtanh.f32 %v1278_v31  ;;  %v2389_v47 = vpop.eup %2388  ;;  %v1371_v18 = vand.u32 2147483647, %v3231_v53  ;;  %vm1369_vm6 = vmor %vm1367_vm5, %vm1368_vm3  ;;  %v1355_v25 = vsel %vm3385_vm4, %v3239_v45, %v1351_v39  ;;  %v2127_v45 = vld [vmem:[%s3552_s7] sm:$0xff] }
 0x2c5   : > { %v1453_v54 = vpack.c.bf16 %v1446_v13, %v1445_v12  ;;  %2392 = vtanh.f32 %v1271_v4  ;;  %v1370_v46 = vsel %vm1369_vm6, %v3295_v21, %v1366_v44  ;;  %v1374_v56 = vor.u32 1.1754944e-38, %v1373_v17  ;;  %v2128_v21 = vld [vmem:[%s3552_s7 + $0x8] sm:$0xff]  ;;  %v2396_v4 = vld [vmem:[%s2877_s18] sm:$0xff] }
 0x2c6   : > { %v1430_v23 = vsel %vm1429_vm12, %v2379_v42, %v1426_v2  ;;  %v1390_v42 = vsel %vm1387_vm1, %v1389_v35, %v1385_v28  ;;  %vm1357_vm8 = vcmp.eq.f32.partialorder %v1356_v38, 8.507059e+37  ;;  %vm1372_vm9 = vcmp.eq.f32.partialorder %v1371_v18, 8.507059e+37 }
 0x2c7   : > { %v1223_v19 = vpop.f32.mrf.mxu0  ;;  %v1435_v27 = vsel %vm1432_vm13, %v1434_v43, %v1430_v23  ;;  %v1449_v33 = vmul.f32 %v2389_v47, %v1390_v42  ;;  %v1360_v50 = vsel %vm1357_vm8, %v1359_v55, %v1355_v25  ;;  %v1375_v53 = vsel %vm1372_vm9, %v1374_v56, %v1370_v46  ;;  %v2398_v47 = vld [vmem:[%s2877_s18 + $0x10] sm:$0xff] }
 0x2c8   : > { %v1224_v32 = vadd.f32 %v1223_v19, %v996_v26  ;;  %v1452_v34 = vmul.f32 %v2387_v9, %v1435_v27  ;;  %v1517_v31 = vpop.permute.xlu2 %1516  ;;  %v2402_v56 = vld [vmem:[%s2877_s18 + $0x30] sm:$0xff] }
 0x2ca   : > { %v1273_v40 = vadd.f32 %v3249_v52, %v1224_v32  ;;  %v1456_v41 = vpack.c.bf16 %v1452_v34, %v1451_v15  ;;  %v2391_v20 = vpop.eup %2390  ;;  %v1507_v16 = vpop.permute.xlu1 %1506 }
 0x2cb   : > { %v1450_v57 = vmul.f32 %v2391_v20, %v1405_v11  ;;  %v2393_v49 = vpop.eup %2392  ;;  %v1512_v11 = vpop.permute.xlu0 %1511 }
 0x2cc   : > { %2394 = vtanh.f32 %v1273_v40  ;;  %1637 = vmatpush.bf16.msra.mxu2 %v1456_v41  ;;  %2218 = vmatpush.bf16.msra.mxu3 %v1456_v41  ;;  %v1447_v59 = vmul.f32 %v2393_v49, %v1360_v50  ;;  %v2399_v41 = vld [vmem:[%s2877_s18 + $0x18] sm:$0xff] }
 0x2cd   : > { %v1455_v7 = vpack.c.bf16 %v1450_v57, %v1449_v33  ;;  %v2400_v57 = vld [vmem:[%s2877_s18 + $0x20] sm:$0xff] }
 0x2d0   : > { %1638 = vmatpush.bf16.msra.mxu2 %v1455_v7  ;;  %2219 = vmatpush.bf16.msra.mxu3 %v1455_v7  ;;  %v3430_v9 = vpop.permute.xlu2 %1531  ;;  %v2401_v7 = vld [vmem:[%s2877_s18 + $0x28] sm:$0xff] }
 0x2d2   : > { %v2395_v58 = vpop.eup %2394  ;;  %v1522_v1 = vpop.permute.xlu1 %1521 }
 0x2d3   : > { %v1448_v48 = vmul.f32 %v2395_v58, %v1375_v53  ;;  %v1527_v53 = vpop.permute.xlu0 %1526 }
 0x2d5   : > { %v1454_v61 = vpack.c.bf16 %v1448_v48, %v1447_v59 }
 0x2d7   : > { %1639 = vmatpush.bf16.msra.mxu2 %v1454_v61  ;;  %2220 = vmatpush.bf16.msra.mxu3 %v1454_v61  ;;  %v2403_v61 = vld [vmem:[%s2877_s18 + $0x38] sm:$0xff] }
 0x2d8   : > { %v3434_v12 = vpop.permute.xlu2 %1546 }
 0x2da   : > { %v3432_v10 = vpop.permute.xlu1 %1536 }
 0x2db   : > { %1640 = vmatpush.bf16.msra.mxu2 %v1453_v54  ;;  %2221 = vmatpush.bf16.msra.mxu3 %v1453_v54 }
 0x2de   : > { %2083 = vmatmul.msk.bf16.vlgmr.msra.gmra.mxu2 %vm1162_vm7, %v2127_v45  ;;  %2090 = vmatmul.msk.bf16.vlgmr.msra.gmra.mxu3 %vm1162_vm7, %v2134_v29 }
 0x2e0   : > { %v1562_v2 = vpop.permute.xlu2 %1561 }
 0x2e2   : > { %v3436_v13 = vpop.permute.xlu1 %1551 }
 0x2ea   : > { %v1567_v26 = vpop.permute.xlu1 %1566 }
 0x2ee   : > { %2084 = vmatmul.msk.bf16.gmra.mxu2 %vm1162_vm7, %v2128_v21 }
 0x2fe   : > { %2085 = vmatmul.msk.bf16.gmra.mxu2 %vm1162_vm7, %v2129_v14 }
 0x30e   : > { %2086 = vmatmul.msk.bf16.gmra.mxu2 %vm1162_vm7, %v2130_v51 }
 0x31e   : > { %2087 = vmatmul.msk.bf16.gmra.mxu2 %vm1162_vm7, %v2131_v62 }
 0x32e   : > { %2088 = vmatmul.msk.bf16.gmra.mxu2 %vm1162_vm7, %v2132_v0 }
 0x33e   : > { %2089 = vmatmul.msk.bf16.gmra.mxu2 %vm1162_vm7, %v2133_v8 }
 0x361   : > { %v1642_v3 = vpop.f32.mrf.mxu2  ;;  %v1677_v22 = vpop.f32.mrf.mxu3 }
 0x362   : > { %v1643_v43 = vadd.f32 %v1642_v3, %v1492_v60  ;;  %v1678_v54 = vadd.f32 %v1677_v22, %v1562_v2 }
 0x364   : > { %v1682_v23 = vadd.f32 %v2396_v4, %v1643_v43  ;;  %1712 = vst [vmem:[%s3440_s29 + $0x30] sm:$0xff] %v1678_v54 }
 0x366   : > { %v1690_v6 = vmul.f32 0.70710677, %v1682_v23 }
 0x368   : > { %1698 = vst [vmem:[%s3444_s30] sm:$0xff] %v1690_v6 }
 0x369   : > { %v1644_v19 = vpop.f32.mrf.mxu2  ;;  %v1679_v27 = vpop.f32.mrf.mxu3 }
 0x36a   : > { %v1645_v28 = vadd.f32 %v1644_v19, %v1497_v5  ;;  %v1680_v36 = vadd.f32 %v1679_v27, %v1567_v26 }
 0x36c   : > { %v1683_v32 = vadd.f32 %v2397_v30, %v1645_v28  ;;  %1713 = vst [vmem:[%s3440_s29 + $0x38] sm:$0xff] %v1680_v36 }
 0x36e   : > { %v1691_v15 = vmul.f32 0.70710677, %v1683_v32 }
 0x370   : > { %1699 = vst [vmem:[%s3444_s30 + $0x8] sm:$0xff] %v1691_v15 }
 0x371   : > { %v1647_v34 = vpop.f32.mrf.mxu2 }
 0x372   : > { %v1648_v37 = vadd.f32 %v1647_v34, %v1502_v63 }
 0x374   : > { %v1684_v35 = vadd.f32 %v2398_v47, %v1648_v37 }
 0x376   : > { %v1692_v24 = vmul.f32 0.70710677, %v1684_v35 }
 0x378   : > { %1700 = vst [vmem:[%s3444_s30 + $0x10] sm:$0xff] %v1692_v24 }
 0x379   : > { %v1649_v39 = vpop.f32.mrf.mxu2 }
 0x37a   : > { %v1650_v40 = vadd.f32 %v1649_v39, %v1507_v16 }
 0x37c   : > { %v1685_v20 = vadd.f32 %v2399_v41, %v1650_v40 }
 0x37e   : > { %v1693_v42 = vmul.f32 0.70710677, %v1685_v20 }
 0x380   : > { %1701 = vst [vmem:[%s3444_s30 + $0x18] sm:$0xff] %v1693_v42 }
 0x381   : > { %v1652_v44 = vpop.f32.mrf.mxu2 }
 0x382   : > { %v1653_v33 = vadd.f32 %v1652_v44, %v1512_v11 }
 0x384   : > { %v1686_v17 = vadd.f32 %v2400_v57, %v1653_v33 }
 0x386   : > { %v1694_v52 = vmul.f32 0.70710677, %v1686_v17 }
 0x388   : > { %1702 = vst [vmem:[%s3444_s30 + $0x20] sm:$0xff] %v1694_v52 }
 0x389   : > { %v1654_v38 = vpop.f32.mrf.mxu2 }
 0x38a   : > { %v1655_v18 = vadd.f32 %v1654_v38, %v1517_v31 }
 0x38c   : > { %v1687_v25 = vadd.f32 %v2401_v7, %v1655_v18 }
 0x38e   : > { %v1695_v46 = vmul.f32 0.70710677, %v1687_v25 }
 0x390   : > { %1703 = vst [vmem:[%s3444_s30 + $0x28] sm:$0xff] %v1695_v46 }
 0x391   : > { %v1657_v49 = vpop.f32.mrf.mxu2 }
 0x392   : > { %v1658_v55 = vadd.f32 %v1657_v49, %v1522_v1 }
 0x394   : > { %v1688_v58 = vadd.f32 %v2402_v56, %v1658_v55 }
 0x396   : > { %v1696_v50 = vmul.f32 0.70710677, %v1688_v58 }
 0x398   : > { %1704 = vst [vmem:[%s3444_s30 + $0x30] sm:$0xff] %v1696_v50 }
 0x399   : > { %v1659_v59 = vpop.f32.mrf.mxu2 }
 0x39a   : > { %v1660_v48 = vadd.f32 %v1659_v59, %v1527_v53 }
 0x39c   : > { %v1689_v45 = vadd.f32 %v2403_v61, %v1660_v48 }
 0x39e   : > { %v1697_v29 = vmul.f32 0.70710677, %v1689_v45 }
 0x3a0   : > { %1705 = vst [vmem:[%s3444_s30 + $0x38] sm:$0xff] %v1697_v29 }
 0x3a1   : > { %v1662_v21 = vpop.f32.mrf.mxu2 }
 0x3a2   : > { %2431 = shalt.err (!%p2428_p11)
}
 0x3a3   : > { %s2536_s18 = smov 128   ;;  %s2537_s30 = smov 256   ;;  %v1663_v14 = vadd.f32 %v1662_v21, %v3430_v9  ;;  %v1542_v0 = vpop.permute.xlu0 %1541 }
 0x3a4   : > { %s2538_s23 = smov 8   ;;  %s1751_s22 = sshll.u32 %s3440_s29, 4  ;;  %s1752_s22 = int_to_ptr.vmem [resolvable:$true] %s1751_s22 }
 0x3a5   : > { %2222 = dma.vmem_to_hbm [thread:$0]  (%p2654_p8), %s1734_s11, 1024, %s1736_s16, %s1715_s13, %s2536_s18, %s2537_s30, %s2538_s23  }
 0x3a6   : > { %1706 = vst [vmem:[%s3440_s29] sm:$0xff] %v1663_v14  ;;  %s3590_s11 = sshll.u32 %s3460_s24, 3  ;;  %s1720_s19 = scalar_lea.sflag [#allocation7], %s2868_s0 }
 0x3a7   : > { %s1750_s28 = scalar_lea.hbm %s3555_s10, %s3590_s11  ;;  %s2452_s11 = scalar_lea.hbm %s3555_s10, 256 }
 0x3a8   : > { %s1753_s25 = sshll.u32 %s1750_s28, 4  ;;  %s1754_s25 = int_to_ptr.hbm [resolvable:$true] %s1753_s25 }
 0x3a9   : > { %v1664_v51 = vpop.f32.mrf.mxu2  ;;  %s2446_s21 = sshra.s32 %s1754_s25, 4  ;;  %s2447_s21 = int_to_ptr.hbm [resolvable:$true] %s2446_s21 }
 0x3aa   : > { %v1665_v62 = vadd.f32 %v1664_v51, %v3432_v10  ;;  %s2448_s26 = scalar_lea.hbm %s2447_s21, 64  ;;  %p2453_p1 = scmp.lt.s32.totalorder %s2447_s21, %s3555_s10 }
 0x3ab   : > { %v1557_v9 = vpop.permute.xlu0 %1556  ;;  %p2449_p12 = scmp.ne.s32.totalorder %s2447_s21, %s2448_s26  ;;  %p2454_p2 = scmp.lt.s32.totalorder %s2452_s11, %s2448_s26 }
 0x3ac   : > { %1707 = vst [vmem:[%s3440_s29 + $0x8] sm:$0xff] %v1665_v62 }
 0x3ad   : > { %p2450_p13 = pnand %p2449_p12, %p2654_p8  ;;  %p2455_p3 = por %p2454_p2, %p2453_p1 }
 0x3af   : > { %p2451_p0 = pneg %p2450_p13 }
 0x3b1   : > { %v1667_v60 = vpop.f32.mrf.mxu2  ;;  %p2456_p4 = pnand %p2455_p3, %p2451_p0 }
 0x3b2   : > { %v1668_v63 = vadd.f32 %v1667_v60, %v1542_v0 }
 0x3b4   : > { %1708 = vst [vmem:[%s3440_s29 + $0x10] sm:$0xff] %v1668_v63 }
 0x3b9   : > { %v1669_v8 = vpop.f32.mrf.mxu2 }
 0x3ba   : > { %v1670_v16 = vadd.f32 %v1669_v8, %v3434_v12 }
 0x3bc   : > { %1709 = vst [vmem:[%s3440_s29 + $0x18] sm:$0xff] %v1670_v16 }
 0x3c1   : > { %v1672_v31 = vpop.f32.mrf.mxu2 }
 0x3c2   : > { %v1673_v1 = vadd.f32 %v1672_v31, %v3436_v13 }
 0x3c4   : > { %1710 = vst [vmem:[%s3440_s29 + $0x20] sm:$0xff] %v1673_v1 }
 0x3c9   : > { %v1674_v10 = vpop.f32.mrf.mxu2 }
 0x3ca   : > { %v1675_v2 = vadd.f32 %v1674_v10, %v1557_v9 }
 0x3cc   : > { %1711 = vst [vmem:[%s3440_s29 + $0x28] sm:$0xff] %v1675_v2 }
 0x3cd   : > { %2459 = shalt.err (!%p2456_p4)
}
 0x3ce   : > { %2223 = dma.vmem_to_hbm [thread:$0]  (%p2654_p8), %s1752_s22, 1024, %s1754_s25, %s1720_s19, %s2536_s18, %s2537_s30, %s2538_s23  }
 0x3cf PF: > { %s3591_s0 = sld [smem:[#allocation10_spill]]  ;;  %p2233_p5 = scmp.ge.s32.totalorder %s2530_s20, 2 }
 0x3d1   : > { %p2227_p6 = pnand %p2233_p5, %p2658_p9 }
 0x3d3   : > { %p2228_p7 = pneg %p2227_p6 }
 0x3d5   : > { %s1768_s28 = sand.u32 1, %s3591_s0  }
 0x3d6   : > { %s1769_s21 = scalar_lea.sflag [#allocation5], %s1768_s28 }
 0x3d7   : > { %2493 = dma.done.wait (%p2228_p7), %s1769_s21, 1024  }
 0x3d8   : > { %2495 = vsyncadd (%p2228_p7), %s1769_s21, 4294966272  ;;  %s1779_s26 = scalar_lea.sflag [#allocation7], %s1768_s28 }
 0x3d9   : > { %2497 = dma.done.wait (%p2228_p7), %s1779_s26, 1024  }
 0x3da   : > { %2499 = vsyncadd (%p2228_p7), %s1779_s26, 4294966272  ;;  %s27_s20 = sadd.s32 1, %s2530_s20   ;;  %s3593_s16 = sld [smem:[#allocation11_spill]] }
 0x3db   : > { %p24_p10 = scmp.ge.s32.totalorder %s27_s20, 6   ;;  %s3594_s17 = sld [smem:[#allocation12_spill]] }
 0x3dc   : > { %s3595_s18 = sld [smem:[#allocation13_spill]]  ;;  %s3597_s13 = smov %s2506_s14 }
 0x3dd   : > { %s3596_s19 = sld [smem:[#allocation14_spill]]  ;;  %s3598_s14 = smov %s2510_s15 }
 0x3de   : > { %s3599_s15 = smov %s2666_s12  ;;  %26 = sbr.rel (!%p24_p10) target bundleno = 9 (0x9), region = 157 }
 0x3e3   :  { %1785 = vsyncpa [#allocation5], 1 }
 0x3e4   :  { %1787 = vsyncpa [#allocation5 + $0x1], 1 }
 0x3e5   :  { %1788 = vsyncpa [#allocation7], 1 }
 0x3e6   :  { %1790 = vsyncpa [#allocation7 + $0x1], 1 }

</bundles_post_ra>
